<compile_context>
chip_gen: v7x
topology: tpu7x:2x2x1
jax: 0.10.0
libtpu: 0.0.40
codegen_flags: <defaults>
</compile_context>

<pallas_src>
import functools

import jax
import jax.numpy as jnp
from jax.experimental import pallas as pl
from jax.experimental.pallas import tpu as pltpu


def _round_up(v, m):
    return (v + m - 1) // m * m


def _tpu_vmem_capacity_bytes():
    # Generation-aware VMEM sizing (v5e/v6e: 128 MiB, v7x: 64 MiB per core).
    # Falls back to the smallest production size if the query is unavailable.
    try:
        return int(pltpu.get_tpu_info().vmem_capacity_bytes)
    except Exception:  # pragma: no cover - conservative fallback
        return 64 * 1024 * 1024


def _vmem_estimate_bytes(bt, n_tok, c, num_heads, wout):
    rows = bt * n_tok
    kt = min(n_tok, 512)
    est = 2 * 2 * rows * c * 4             # x in-block + out-block, double-buffered, f32
    est += rows * wout * 4                 # fused projection result, f32
    est += 2 * rows * c * 2                # bf16 copies of x and q/k
    est += 2 * num_heads * n_tok * kt * 4  # one batch element's score/prob key tile, f32
    est += 2 * c * wout * 2                # fused bf16 weight, double-buffered
    return est


def _pick_block_batch(B, n_tok, c, num_heads, wout, budget):
    # Largest divisor of B whose working set fits the VMEM budget, stopping
    # once a step feeds >= 256 MXU rows (v6e/v7x MXU depth; >=128 covers v5e).
    # bt == B is always layout-legal (block == full array); otherwise the row
    # block must be sublane (8) aligned.
    cands = [bt for bt in range(1, B + 1)
             if B % bt == 0 and ((bt * n_tok) % 8 == 0 or bt == B)]
    choice = cands[0]
    for bt in cands[1:]:
        if choice * n_tok >= 256:
            break
        if _vmem_estimate_bytes(bt, n_tok, c, num_heads, wout) > budget:
            break
        choice = bt
    return choice


def _dynamic_fusion_kernel(x_ref, w_ref, b_ref, out_ref, *,
                           num_heads, head_dim, n_tok, block_b, c, cseg,
                           key_tile):
    rows = block_b * n_tok
    x = x_ref[...]                                        # (rows, C)
    xb = x.astype(jnp.bfloat16)

    # Single fused projection (one MXU weight stream, f32 accumulation):
    #   cols [0:C)             -> Q  (attention scale pre-folded)
    #   cols [cseg:cseg+C)     -> K
    #   cols [2*cseg:2*cseg+H) -> Vp (proj Linear(C->1) pre-folded per head)
    qkv = jnp.dot(xb, w_ref[...], preferred_element_type=jnp.float32) + b_ref[...]
    q = qkv[:, :c]
    k = qkv[:, cseg:cseg + c]
    vp = qkv[:, 2 * cseg:2 * cseg + num_heads]            # (rows, H) f32

    qh = q.astype(jnp.bfloat16).reshape(rows, num_heads, head_dim)
    kh = k.astype(jnp.bfloat16).reshape(rows, num_heads, head_dim)

    cw_parts = []
    for b in range(block_b):                              # static unroll over batch tile
        r0 = b * n_tok
        qb = qh[r0:r0 + n_tok]                            # (N, H, hd) bf16
        kb = kh[r0:r0 + n_tok]                            # (N, H, hd) bf16
        vb = vp[r0:r0 + n_tok].T                          # (H, N)     f32

        # Key-tiled online softmax: only (H, N, 1) running stats are carried,
        # the full (H, N, N) probability tensor is never materialized.
        m_run = jnp.full((num_heads, n_tok, 1), -1e30, jnp.float32)
        den = jnp.zeros((num_heads, n_tok, 1), jnp.float32)
        num = jnp.zeros((num_heads, n_tok, 1), jnp.float32)
        for t0 in range(0, n_tok, key_tile):              # static unroll over key tiles
            t1 = min(t0 + key_tile, n_tok)
            s_t = jnp.einsum('nhd,mhd->hnm', qb, kb[t0:t1],
                             preferred_element_type=jnp.float32)  # (H, N, Tk) f32
            m_new = jnp.maximum(m_run, jnp.max(s_t, axis=-1, keepdims=True))
            alpha = jnp.exp(m_run - m_new)
            p_t = jnp.exp(s_t - m_new)
            den = alpha * den + jnp.sum(p_t, axis=-1, keepdims=True)
            # attn @ vp has width 1 per head -> VPU multiply + lane reduce.
            num = alpha * num + jnp.sum(p_t * vb[:, None, t0:t1], axis=-1,
                                        keepdims=True)
            m_run = m_new

        # Head reduction + EUP approximate reciprocal; queries already sit on
        # the sublane axis so cw comes out (N, 1) with no extra transpose.
        cw_parts.append(jnp.sum(num * pl.reciprocal(den, approx=True), axis=0))

    cw = cw_parts[0] if block_b == 1 else jnp.concatenate(cw_parts, axis=0)
    out_ref[...] = (x * cw).astype(out_ref.dtype)         # x * cw_weights


def dynamic_fusion(x, wqkv, bqkv, wproj, bproj, *, num_heads=8):
    B, N, C = x.shape
    assert C % num_heads == 0
    head_dim = C // num_heads
    scale = head_dim ** (-0.5)

    f32 = jnp.float32
    wqkv = wqkv.astype(f32)
    bqkv = bqkv.astype(f32)
    wproj = wproj.astype(f32)
    bproj = bproj.astype(f32)

    # Split the fused qkv weight (PyTorch Linear stores (out, in)).
    wq, wk, wv = wqkv[:C], wqkv[C:2 * C], wqkv[2 * C:]
    bq, bk, bv = bqkv[:C], bqkv[C:2 * C], bqkv[2 * C:]

    # Fold the attention scale into Q (trace-time constant fold).
    wq = wq * scale
    bq = bq * scale

    # Fold proj (Linear C -> 1) into V per head:
    #   Wvp[h, j] = sum_d wproj[0, h*hd+d] * Wv[h*hd+d, j]
    #   bvp[h]    = sum_d wproj[0, h*hd+d] * bv[h*hd+d]  (+ bproj / H, since
    #   softmax rows sum to 1 the proj bias folds into the per-head vp bias).
    wproj_h = wproj.reshape(num_heads, head_dim)
    wvp = jnp.einsum('hd,hdj->hj', wproj_h, wv.reshape(num_heads, head_dim, C))
    bvp = jnp.sum(wproj_h * bv.reshape(num_heads, head_dim), axis=-1)
    bvp = bvp + bproj[0] / num_heads

    # One fused (C, 2*cseg + 128) bf16 weight, segments 128-lane aligned so the
    # in-kernel column slices stay lane-aligned for any C.
    cseg = _round_up(C, 128)
    wout = 2 * cseg + 128
    w_fused = jnp.zeros((C, wout), f32)
    w_fused = w_fused.at[:, :C].set(wq.T)
    w_fused = w_fused.at[:, cseg:cseg + C].set(wk.T)
    w_fused = w_fused.at[:, 2 * cseg:2 * cseg + num_heads].set(wvp.T)
    w_fused = w_fused.astype(jnp.bfloat16)

    b_fused = jnp.zeros((1, wout), f32)
    b_fused = b_fused.at[0, :C].set(bq)
    b_fused = b_fused.at[0, cseg:cseg + C].set(bk)
    b_fused = b_fused.at[0, 2 * cseg:2 * cseg + num_heads].set(bvp)

    vmem_cap = _tpu_vmem_capacity_bytes()
    vmem_limit = max(32 * 1024 * 1024, vmem_cap * 3 // 4)   # leave compiler headroom
    bt = _pick_block_batch(B, N, C, num_heads, wout, int(vmem_limit * 0.6))
    rows_blk = bt * N
    key_tile = min(N, 512)

    kernel = functools.partial(
        _dynamic_fusion_kernel, num_heads=num_heads, head_dim=head_dim,
        n_tok=N, block_b=bt, c=C, cseg=cseg, key_tile=key_tile)

    # Flatten (B, N, C) -> (B*N, C) wrapper-side: 2-D sublane-dense blocks and
    # a single row-block grid axis.  Weights/bias use a constant index_map so
    # the pipeline never re-fetches them after the first step.
    x2 = x.reshape(B * N, C)
    out2 = pl.pallas_call(
        kernel,
        out_shape=jax.ShapeDtypeStruct((B * N, C), x.dtype),
        grid=(B // bt,),
        in_specs=[
            pl.BlockSpec((rows_blk, C), lambda i: (i, 0)),   # x row block
            pl.BlockSpec((C, wout), lambda i: (0, 0)),       # fused bf16 weight
            pl.BlockSpec((1, wout), lambda i: (0, 0)),       # fused f32 bias
        ],
        out_specs=pl.BlockSpec((rows_blk, C), lambda i: (i, 0)),
        compiler_params=pltpu.CompilerParams(
            dimension_semantics=("parallel",),
            vmem_limit_bytes=int(vmem_limit)),
    )(x2, w_fused, b_fused)
    return out2.reshape(B, N, C)


def _reference(x, wqkv, bqkv, wproj, bproj, num_heads=8):
    # Pure-JAX f32 mirror of the PyTorch forward for validation.
    B, N, C = x.shape
    hd = C // num_heads
    scale = hd ** (-0.5)
    qkv = x @ wqkv.T + bqkv                                   # (B, N, 3C)
    qkv = qkv.reshape(B, N, 3, num_heads, hd).transpose(2, 0, 3, 1, 4)
    q, k, v = qkv[0], qkv[1], qkv[2]                          # (B, H, N, hd)
    attn = jax.nn.softmax((q * scale) @ jnp.swapaxes(k, -2, -1), axis=-1)
    o = (attn @ v).transpose(0, 2, 1, 3).reshape(B, N, C)
    cw = o @ wproj.T + bproj                                  # (B, N, 1)
    return x * cw


def _run_case(key, B, N, C, num_heads):
    kx, k1, k2, k3, k4 = jax.random.split(key, 5)
    x = jax.random.normal(kx, (B, N, C), dtype=jnp.float32)

    # Deterministic "Linear"-style init (uniform +-1/sqrt(fan_in)).
    bound = 1.0 / (C ** 0.5)
    wqkv = jax.random.uniform(k1, (3 * C, C), jnp.float32, -bound, bound)
    bqkv = jax.random.uniform(k2, (3 * C,), jnp.float32, -bound, bound)
    wproj = jax.random.uniform(k3, (1, C), jnp.float32, -bound, bound)
    bproj = jax.random.uniform(k4, (1,), jnp.float32, -bound, bound)

    out = dynamic_fusion(x, wqkv, bqkv, wproj, bproj, num_heads=num_heads)
    out = jax.block_until_ready(out)
    ref = _reference(x, wqkv, bqkv, wproj, bproj, num_heads=num_heads)
    # Tolerance covers bf16 MXU operands (f32 accumulation) and the
    # approximate EUP reciprocal in the softmax.
    assert jnp.allclose(out, ref, atol=5e-2, rtol=5e-2), (
        f"mismatch vs reference for shape {(B, N, C)}")


if __name__ == "__main__":
    key = jax.random.PRNGKey(0)
    k0, k1 = jax.random.split(key)
    # in_planes = 32, num_heads = 8 -> head_dim = 4  (batch tile 2, grid 1)
    _run_case(k0, B=2, N=8, C=32, num_heads=8)
    # in_planes = 64, num_heads = 8 -> head_dim = 8  (batch tile 4, grid 1)
    _run_case(k1, B=4, N=16, C=64, num_heads=8)
    print("KERNEL_OK")
</pallas_src>

<mosaic_0001>
module attributes {stable_mosaic.version = 11 : i64} {
  func.func @_dynamic_fusion_kernel(%arg0: i32, %arg1: memref<16x32xf32, #tpu.memory_space<vmem>>, %arg2: memref<32x384xbf16, #tpu.memory_space<vmem>>, %arg3: memref<1x384xf32, #tpu.memory_space<vmem>>, %arg4: memref<16x32xf32, #tpu.memory_space<vmem>>) attributes {dimension_semantics = [#tpu.dimension_semantics<parallel>], iteration_bounds = array<i64: 1>, scalar_prefetch = 0 : i64, scratch_operands = 0 : i64, tpu.core_type = #tpu.core_type<tc>, window_params = [{transform_indices = @transform_0, window_bounds = array<i64: 16, 32>}, {pipeline_mode = #tpu.pipeline_mode<synchronous>, transform_indices = @transform_1, window_bounds = array<i64: 32, 384>}, {pipeline_mode = #tpu.pipeline_mode<synchronous>, transform_indices = @transform_2, window_bounds = array<i64: 1, 384>}, {transform_indices = @transform_3, window_bounds = array<i64: 16, 32>}]} {
    %c0 = arith.constant 0 : index
    %c0_0 = arith.constant 0 : index
    %0 = vector.load %arg1[%c0, %c0_0] : memref<16x32xf32, #tpu.memory_space<vmem>>, vector<16x32xf32>
    %1 = arith.truncf %0 : vector<16x32xf32> to vector<16x32xbf16>
    %c0_1 = arith.constant 0 : index
    %c0_2 = arith.constant 0 : index
    %2 = vector.load %arg2[%c0_1, %c0_2] : memref<32x384xbf16, #tpu.memory_space<vmem>>, vector<32x384xbf16>
    %cst = arith.constant dense<0.000000e+00> : vector<16x384xf32>
    %3 = tpu.matmul %1, %2, %cst {dimension_numbers = #tpu.dot_dimension_numbers<[1], [0], [0], [1], [0, 0, 1, 1], [], []>} : vector<16x32xbf16>, vector<32x384xbf16>, vector<16x384xf32> -> vector<16x384xf32>
    %c0_3 = arith.constant 0 : index
    %c0_4 = arith.constant 0 : index
    %4 = vector.load %arg3[%c0_3, %c0_4] : memref<1x384xf32, #tpu.memory_space<vmem>>, vector<1x384xf32>
    %5 = vector.broadcast %4 : vector<1x384xf32> to vector<16x384xf32>
    %6 = arith.addf %3, %5 : vector<16x384xf32>
    %7 = vector.extract_strided_slice %6 {offsets = [0, 0], sizes = [16, 32], strides = [1, 1]} : vector<16x384xf32> to vector<16x32xf32>
    %8 = vector.extract_strided_slice %6 {offsets = [0, 128], sizes = [16, 32], strides = [1, 1]} : vector<16x384xf32> to vector<16x32xf32>
    %9 = vector.extract_strided_slice %6 {offsets = [0, 256], sizes = [16, 8], strides = [1, 1]} : vector<16x384xf32> to vector<16x8xf32>
    %10 = arith.truncf %7 : vector<16x32xf32> to vector<16x32xbf16>
    %11 = vector.shape_cast %10 : vector<16x32xbf16> to vector<16x8x4xbf16>
    %12 = arith.truncf %8 : vector<16x32xf32> to vector<16x32xbf16>
    %13 = vector.shape_cast %12 : vector<16x32xbf16> to vector<16x8x4xbf16>
    %14 = vector.extract_strided_slice %11 {offsets = [0, 0, 0], sizes = [8, 8, 4], strides = [1, 1, 1]} : vector<16x8x4xbf16> to vector<8x8x4xbf16>
    %15 = vector.extract_strided_slice %13 {offsets = [0, 0, 0], sizes = [8, 8, 4], strides = [1, 1, 1]} : vector<16x8x4xbf16> to vector<8x8x4xbf16>
    %16 = vector.extract_strided_slice %9 {offsets = [0, 0], sizes = [8, 8], strides = [1, 1]} : vector<16x8xf32> to vector<8x8xf32>
    %17 = tpu.transpose %16, [1, 0] : vector<8x8xf32> -> vector<8x8xf32>
    %cst_5 = arith.constant -1.000000e+30 : f32
    %18 = vector.broadcast %cst_5 : f32 to vector<8x8x1xf32>
    %cst_6 = arith.constant 0.000000e+00 : f32
    %19 = vector.broadcast %cst_6 : f32 to vector<8x8x1xf32>
    %cst_7 = arith.constant 0.000000e+00 : f32
    %20 = vector.broadcast %cst_7 : f32 to vector<8x8x1xf32>
    "tpu.trace_start"() <{level = 10 : i32, message = "nhd,mhd->hnm"}> : () -> ()
    %cst_8 = arith.constant dense<0.000000e+00> : vector<8x8x8xf32>
    %21 = tpu.matmul %14, %15, %cst_8 {dimension_numbers = #tpu.dot_dimension_numbers<[2], [2], [0], [0], [0, 1, 0, 0, 1, 0], [1], [1]>} : vector<8x8x4xbf16>, vector<8x8x4xbf16>, vector<8x8x8xf32> -> vector<8x8x8xf32>
    "tpu.trace_stop"() : () -> ()
    %cst_9 = arith.constant dense<0xFF800000> : vector<8x8xf32>
    %22 = vector.multi_reduction <maximumf>, %21, %cst_9 [2] : vector<8x8x8xf32> to vector<8x8xf32>
    %23 = vector.shape_cast %22 : vector<8x8xf32> to vector<8x8x1xf32>
    %24 = arith.maximumf %18, %23 : vector<8x8x1xf32>
    %25 = arith.subf %18, %24 : vector<8x8x1xf32>
    %26 = math.exp %25 : vector<8x8x1xf32>
    %27 = vector.broadcast %24 : vector<8x8x1xf32> to vector<8x8x8xf32>
    %28 = arith.subf %21, %27 : vector<8x8x8xf32>
    %29 = math.exp %28 : vector<8x8x8xf32>
    %30 = arith.mulf %26, %19 : vector<8x8x1xf32>
    %cst_10 = arith.constant dense<0.000000e+00> : vector<8x8xf32>
    %31 = vector.multi_reduction <add>, %29, %cst_10 [2] : vector<8x8x8xf32> to vector<8x8xf32>
    %32 = vector.shape_cast %31 : vector<8x8xf32> to vector<8x8x1xf32>
    %33 = arith.addf %30, %32 : vector<8x8x1xf32>
    %34 = arith.mulf %26, %20 : vector<8x8x1xf32>
    %35 = vector.shape_cast %17 : vector<8x8xf32> to vector<8x1x8xf32>
    %36 = vector.broadcast %35 : vector<8x1x8xf32> to vector<8x8x8xf32>
    %37 = arith.mulf %29, %36 : vector<8x8x8xf32>
    %cst_11 = arith.constant dense<0.000000e+00> : vector<8x8xf32>
    %38 = vector.multi_reduction <add>, %37, %cst_11 [2] : vector<8x8x8xf32> to vector<8x8xf32>
    %39 = vector.shape_cast %38 : vector<8x8xf32> to vector<8x8x1xf32>
    %40 = arith.addf %34, %39 : vector<8x8x1xf32>
    %41 = tpu.reciprocal %33 {approx = true} : vector<8x8x1xf32> -> vector<8x8x1xf32>
    %42 = arith.mulf %40, %41 : vector<8x8x1xf32>
    %cst_12 = arith.constant dense<0.000000e+00> : vector<8x1xf32>
    %43 = vector.multi_reduction <add>, %42, %cst_12 [0] : vector<8x8x1xf32> to vector<8x1xf32>
    %44 = vector.extract_strided_slice %11 {offsets = [8, 0, 0], sizes = [8, 8, 4], strides = [1, 1, 1]} : vector<16x8x4xbf16> to vector<8x8x4xbf16>
    %45 = vector.extract_strided_slice %13 {offsets = [8, 0, 0], sizes = [8, 8, 4], strides = [1, 1, 1]} : vector<16x8x4xbf16> to vector<8x8x4xbf16>
    %46 = vector.extract_strided_slice %9 {offsets = [8, 0], sizes = [8, 8], strides = [1, 1]} : vector<16x8xf32> to vector<8x8xf32>
    %47 = tpu.transpose %46, [1, 0] : vector<8x8xf32> -> vector<8x8xf32>
    %cst_13 = arith.constant -1.000000e+30 : f32
    %48 = vector.broadcast %cst_13 : f32 to vector<8x8x1xf32>
    %cst_14 = arith.constant 0.000000e+00 : f32
    %49 = vector.broadcast %cst_14 : f32 to vector<8x8x1xf32>
    %cst_15 = arith.constant 0.000000e+00 : f32
    %50 = vector.broadcast %cst_15 : f32 to vector<8x8x1xf32>
    "tpu.trace_start"() <{level = 10 : i32, message = "nhd,mhd->hnm"}> : () -> ()
    %cst_16 = arith.constant dense<0.000000e+00> : vector<8x8x8xf32>
    %51 = tpu.matmul %44, %45, %cst_16 {dimension_numbers = #tpu.dot_dimension_numbers<[2], [2], [0], [0], [0, 1, 0, 0, 1, 0], [1], [1]>} : vector<8x8x4xbf16>, vector<8x8x4xbf16>, vector<8x8x8xf32> -> vector<8x8x8xf32>
    "tpu.trace_stop"() : () -> ()
    %cst_17 = arith.constant dense<0xFF800000> : vector<8x8xf32>
    %52 = vector.multi_reduction <maximumf>, %51, %cst_17 [2] : vector<8x8x8xf32> to vector<8x8xf32>
    %53 = vector.shape_cast %52 : vector<8x8xf32> to vector<8x8x1xf32>
    %54 = arith.maximumf %48, %53 : vector<8x8x1xf32>
    %55 = arith.subf %48, %54 : vector<8x8x1xf32>
    %56 = math.exp %55 : vector<8x8x1xf32>
    %57 = vector.broadcast %54 : vector<8x8x1xf32> to vector<8x8x8xf32>
    %58 = arith.subf %51, %57 : vector<8x8x8xf32>
    %59 = math.exp %58 : vector<8x8x8xf32>
    %60 = arith.mulf %56, %49 : vector<8x8x1xf32>
    %cst_18 = arith.constant dense<0.000000e+00> : vector<8x8xf32>
    %61 = vector.multi_reduction <add>, %59, %cst_18 [2] : vector<8x8x8xf32> to vector<8x8xf32>
    %62 = vector.shape_cast %61 : vector<8x8xf32> to vector<8x8x1xf32>
    %63 = arith.addf %60, %62 : vector<8x8x1xf32>
    %64 = arith.mulf %56, %50 : vector<8x8x1xf32>
    %65 = vector.shape_cast %47 : vector<8x8xf32> to vector<8x1x8xf32>
    %66 = vector.broadcast %65 : vector<8x1x8xf32> to vector<8x8x8xf32>
    %67 = arith.mulf %59, %66 : vector<8x8x8xf32>
    %cst_19 = arith.constant dense<0.000000e+00> : vector<8x8xf32>
    %68 = vector.multi_reduction <add>, %67, %cst_19 [2] : vector<8x8x8xf32> to vector<8x8xf32>
    %69 = vector.shape_cast %68 : vector<8x8xf32> to vector<8x8x1xf32>
    %70 = arith.addf %64, %69 : vector<8x8x1xf32>
    %71 = tpu.reciprocal %63 {approx = true} : vector<8x8x1xf32> -> vector<8x8x1xf32>
    %72 = arith.mulf %70, %71 : vector<8x8x1xf32>
    %cst_20 = arith.constant dense<0.000000e+00> : vector<8x1xf32>
    %73 = vector.multi_reduction <add>, %72, %cst_20 [0] : vector<8x8x1xf32> to vector<8x1xf32>
    %74 = tpu.concatenate %43, %73 in 0 : vector<8x1xf32>, vector<8x1xf32> -> vector<16x1xf32>
    %75 = vector.broadcast %74 : vector<16x1xf32> to vector<16x32xf32>
    %76 = arith.mulf %0, %75 : vector<16x32xf32>
    %c0_21 = arith.constant 0 : index
    %c0_22 = arith.constant 0 : index
    %77 = vector.load %arg4[%c0_21, %c0_22] : memref<16x32xf32, #tpu.memory_space<vmem>>, vector<16x32xf32>
    tpu.vector_store %arg4[%c0_21, %c0_22], %76 {strides = array<i32>} : memref<16x32xf32, #tpu.memory_space<vmem>>, vector<16x32xf32>,
    return
  }
  func.func @transform_0(%arg0: i32) -> (i32, i32) {
    %c0_i32 = arith.constant 0 : i32
    %c0_i32_0 = arith.constant 0 : i32
    return %arg0, %c0_i32 : i32, i32
  }
  func.func @transform_1(%arg0: i32) -> (i32, i32) {
    %c0_i32 = arith.constant 0 : i32
    %c0_i32_0 = arith.constant 0 : i32
    %c0_i32_1 = arith.constant 0 : i32
    return %c0_i32, %c0_i32_0 : i32, i32
  }
  func.func @transform_2(%arg0: i32) -> (i32, i32) {
    %c0_i32 = arith.constant 0 : i32
    %c0_i32_0 = arith.constant 0 : i32
    %c0_i32_1 = arith.constant 0 : i32
    return %c0_i32, %c0_i32_0 : i32, i32
  }
  func.func @transform_3(%arg0: i32) -> (i32, i32) {
    %c0_i32 = arith.constant 0 : i32
    %c0_i32_0 = arith.constant 0 : i32
    return %arg0, %c0_i32 : i32, i32
  }
}

</mosaic_0001>

<bundles_post_ra>
// kernel: tpu_custom_call.1
= control target key start
LH: loop header
LB: loop body
LE: loop exit
PB: predicated region body
PF: predicated region fallthrough
CT: control target
= control target key end

     0   :  { %8 = vsyncpa [#allocation3], 0  ;;  %s3951_s0 = inlined_call_operand.hbm [shape: f32[16,32], index: 0, kind: input, shape index: {}]   ;;  %s3952_s1 = inlined_call_operand.hbm [shape: bf16[32,384], index: 1, kind: input, shape index: {}]   ;;  %s3953_s2 = inlined_call_operand.vmem [shape: f32[1,384], index: 2, kind: input, shape index: {}]   ;;  %s3954_s3 = inlined_call_operand.hbm [shape: f32[16,32], index: 3, kind: output, shape index: {}]  }
   0x1   :  { %9 = vsyncpa [#allocation6], 0 }
   0x2   :  { %10 = vsyncpa [#allocation4], 0  ;;  %s3185_s12 = smov [#allocation2]   ;;  %s3113_s16 = scalar_lea.hbm %s3951_s0, 256 }
   0x3   :  { %s16_s13 = sshll.u32 %s3185_s12, 4  ;;  %p3114_p0 = scmp.ne.s32.totalorder %s3951_s0, %s3113_s16  ;;  %s17_s13 = int_to_ptr.vmem [resolvable:$true] %s16_s13 }
   0x4   :  { %p3117_p1 = scmp.lt.u32.totalorder %s3113_s16, %s3951_s0 }
   0x6   :  { %p3119_p2 = pnand %p3117_p1, %p3114_p0 }
   0x8   :  { %3122 = shalt.err (!%p3119_p2)
}
   0x9   :  { %s3123_s21 = scalar_lea.vmem %s17_s13, 256  ;;  %p3128_p4 = scmp.lt.s32.totalorder %s17_s13, %s17_s13 }
   0xa   :  { %p3124_p3 = scmp.ne.s32.totalorder %s17_s13, %s3123_s21  ;;  %p3129_p5 = scmp.lt.s32.totalorder %s3123_s21, %s3123_s21 }
   0xc   :  { %p3130_p6 = por %p3129_p5, %p3128_p4 }
   0xe   :  { %p3131_p7 = pnand %p3130_p6, %p3124_p3 }
  0x10   :  { %3134 = shalt.err (!%p3131_p7)
}
  0x11   :  { %s3186_s22 = smov 128   ;;  %s3187_s23 = smov 8  }
  0x12   :  { %22 = dma.hbm_to_vmem [thread:$0]  %s3951_s0, 256, %s17_s13, [#allocation3], %s3186_s22, %s3186_s22, %s3187_s23  }
  0x13   :  { %s3188_s26 = smov [#allocation5]   ;;  %s3135_s30 = scalar_lea.hbm %s3952_s1, 768 }
  0x14   :  { %s28_s27 = sshll.u32 %s3188_s26, 4  ;;  %p3136_p8 = scmp.ne.s32.totalorder %s3952_s1, %s3135_s30  ;;  %s29_s27 = int_to_ptr.vmem [resolvable:$true] %s28_s27 }
  0x15   :  { %p3139_p9 = scmp.lt.u32.totalorder %s3135_s30, %s3952_s1 }
  0x17   :  { %p3141_p10 = pnand %p3139_p9, %p3136_p8 }
  0x19   :  { %3144 = shalt.err (!%p3141_p10)
}
  0x1a   :  { %s3145_s8 = scalar_lea.vmem %s29_s27, 768  ;;  %p3150_p12 = scmp.lt.s32.totalorder %s29_s27, %s29_s27 }
  0x1b   :  { %p3146_p11 = scmp.ne.s32.totalorder %s29_s27, %s3145_s8  ;;  %p3151_p13 = scmp.lt.s32.totalorder %s3145_s8, %s3145_s8 }
  0x1d   :  { %p3152_p0 = por %p3151_p13, %p3150_p12 }
  0x1f   :  { %p3153_p1 = pnand %p3152_p0, %p3146_p11 }
  0x21   :  { %3156 = shalt.err (!%p3153_p1)
}
  0x22   :  { %s3189_s0 = smov 192   ;;  %s3190_s9 = smov 12  }
  0x23   :  { %34 = dma.hbm_to_vmem [thread:$0]  %s3952_s1, 768, %s29_s27, [#allocation6], %s3189_s0, %s3189_s0, %s3190_s9  }
  0x24   :  { %3179 = dma.done.wait [#allocation3], 256  }
  0x25   :  { %3180 = vsyncadd [#allocation3], 4294967040 }
  0x26   :  { %3181 = dma.done.wait [#allocation6], 768  }
  0x27   :  { %3182 = vsyncadd [#allocation6], 4294966528  ;;  %v3191_v0 = vmov 0   ;;  %v3006_v1 = vld [vmem:[#allocation5 + $0x4] ss:$12 sps:$4 sm:$0xff]   ;;  %v45_v6 = vld [vmem:[#allocation2 + $0x8] sm:$0xff]  ;;  %v57_v8 = vlaneseq }
  0x28   :  { %140 = vmatprep.mubr.bf16.mxu0 %v3191_v0  ;;  %v3008_v2 = vld [vmem:[#allocation5] ss:$12 sps:$4 sm:$0xff]   ;;  %108 = vmatprep.subr.bf16.mxu0 %v3006_v1  ;;  %v3009_v3 = vld [vmem:[#allocation5 + $0x1c] ss:$12 sps:$4 sm:$0xff]   ;;  %v3011_v4 = vld [vmem:[#allocation5 + $0x18] ss:$12 sps:$4 sm:$0xff]  }
  0x29   :  { %109 = vmatpush1.bf16.msra.mxu0 %v3008_v2  ;;  %v44_v5 = vld [vmem:[#allocation2] sm:$0xff]  ;;  %vm104_vm0 = vcmask 261120   ;;  %v3257_v9 = vshrl.u32 %v57_v8, 7  ;;  %s3192_s13 = smov 116   ;;  %s3193_s14 = smov 124   ;;  %vm3202_vm1 = vmmov 0  }
  0x2a   :  { %110 = vmatprep.subr.bf16.mxu0 %v3009_v3  ;;  %v3253_v7 = vpack.c.bf16 %v45_v6, %v44_v5  ;;  %v55_v11 = vld [vmem:[%s3953_s2] sm:$0x7]  ;;  %s3194_s15 = smov 112   ;;  %s3195_s16 = smov 120   ;;  %v3199_v27 = vmov 1983009808  }
  0x2b   :  { %v3260_v10 = vsub.s32 0, %v3257_v9  ;;  %v63_v12 = vsub.s32 1, %v3257_v9  ;;  %s3196_s17 = smov 104   ;;  %s3197_s18 = smov 108   ;;  %v243_v28 = vunpack.c.l.s4 %v3199_v27  ;;  %v3200_v32 = vmov 1934713408  }
  0x2c   :  { %s3198_s19 = smov 100   ;;  %v275_v33 = vunpack.c.l.s4 %v3200_v32  ;;  %vm1034_vm2 = vcmask 1041408   ;;  %vm1030_vm3 = vcmask 31744   ;;  %vm1400_vm4 = vcmask 64512  }
  0x2d   :  { %111 = vmatpush1.bf16.msra.mxu0 %v3011_v4  ;;  %v60_v13 = vrot.slane %v55_v11, %v3260_v10  ;;  %v64_v15 = vrot.slane %v55_v11, %v63_v12  ;;  %v244_v31 = vunpack.c.0.s8 %v243_v28 }
  0x2e   :  { %v276_v41 = vunpack.c.0.s8 %v275_v33 }
  0x2f   :  { %v3277_v40 = vsub.s32 %v244_v31, %v3257_v9 }
  0x30   :  { %2823 = vmatmul.mubr.msk.bf16.vlgmr.msra.gmra.mrb[0].mxu0 %vm104_vm0, %v3253_v7  ;;  %v3282_v63 = vsub.s32 %v276_v41, %v3257_v9 }
 0x103   :  { %v142_v14 = vpop.f32.mrb[0].mxu0 }
 0x104   :  { %v144_v16 = vpop.f32.mrb[1].mxu0  ;;  %v143_v18 = vadd.f32 %v142_v14, %v60_v13 }
 0x105   :  { %v146_v17 = vpop.f32.mrb[2].mxu0  ;;  %v145_v21 = vadd.f32 %v144_v16, %v64_v15 }
 0x106   :  { %v147_v19 = vadd.f32 %v146_v17, %v60_v13  ;;  %v148_v20 = vpop.f32.mrb[3].mxu0 }
 0x107   :  { %v149_v22 = vadd.f32 %v148_v20, %v64_v15 }
 0x108   :  { %v3267_v23 = vpack.c.bf16 %v147_v19, %v143_v18 }
 0x109   :  { %v376_v24 = vpack.c.bf16 %v149_v22, %v145_v21 }
 0x10b   :  { %382 = vrot.lane.b32.xlu1 %v376_v24, %s3192_s13  ;;  %378 = vrot.lane.b32.xlu0 %v376_v24, %s3193_s14  ;;  %v396_v46 = vshrl.u32 %v376_v24, 16 }
 0x10f   :  { %384 = vrot.lane.b32.xlu1 %v376_v24, %s3194_s15  ;;  %380 = vrot.lane.b32.xlu0 %v376_v24, %s3195_s16 }
 0x113   :  { %388 = vrot.lane.b32.xlu1 %v376_v24, %s3196_s17  ;;  %386 = vrot.lane.b32.xlu0 %v376_v24, %s3197_s18 }
 0x117   :  { %390 = vrot.lane.b32.xlu0 %v376_v24, %s3198_s19  ;;  %196 = vrot.lane.b32.xlu1 %v3267_v23, %s3195_s16 }
 0x11b   :  { %198 = vrot.lane.b32.xlu1 %v3267_v23, %s3192_s13  ;;  %194 = vrot.lane.b32.xlu0 %v3267_v23, %s3193_s14 }
 0x11f   :  { %202 = vrot.lane.b32.xlu1 %v3267_v23, %s3197_s18  ;;  %200 = vrot.lane.b32.xlu0 %v3267_v23, %s3194_s15 }
 0x17d   :  { %v383_v25 = vpop.permute.xlu1 %382  ;;  %v379_v26 = vpop.permute.xlu0 %378 }
 0x17e   :  { %v397_v38 = vshrl.u32 %v379_v26, 16  ;;  %v394_v42 = vpack.i.b16 %v379_v26, %v376_v24  ;;  %v405_v50 = vshrl.u32 %v383_v25, 16 }
 0x180   :  { %v398_v54 = vpack.i.b16 %v397_v38, %v396_v46 }
 0x181   :  { %v385_v29 = vpop.permute.xlu1 %384  ;;  %v381_v30 = vpop.permute.xlu0 %380 }
 0x182   :  { %v412_v39 = vshrl.u32 %v385_v29, 16  ;;  %v404_v43 = vshrl.u32 %v381_v30, 16  ;;  %v402_v47 = vpack.i.b16 %v383_v25, %v381_v30 }
 0x184   :  { %v406_v56 = vpack.i.b16 %v405_v50, %v404_v43  ;;  %v3201_v50 = vmov 0.0  }
 0x185   :  { %v389_v34 = vpop.permute.xlu1 %388  ;;  %v387_v35 = vpop.permute.xlu0 %386  ;;  %2880 = vmatprep.subr.bf16.mxu1 %v3201_v50  ;;  %2888 = vmatprep.subr.bf16.mxu0 %v3201_v50 }
 0x186   :  { %v413_v36 = vshrl.u32 %v387_v35, 16  ;;  %v410_v37 = vpack.i.b16 %v387_v35, %v385_v29  ;;  %v420_v51 = vshrl.u32 %v389_v34, 16  ;;  %2884 = vmatprep.mubr.msk.bf16.mxu1 %vm3202_vm1, %v3201_v50  ;;  %2890 = vmatprep.mubr.msk.bf16.mxu0 %vm3202_vm1, %v3201_v50 }
 0x188   :  { %v414_v48 = vpack.i.b16 %v413_v36, %v412_v39  ;;  %v424_v52 = vcombine.low %v394_v42, %v410_v37  ;;  %v425_v25 = vcombine.high %v394_v42, %v410_v37 }
 0x189   :  { %v391_v44 = vpop.permute.xlu0 %390  ;;  %v197_v45 = vpop.permute.xlu1 %196 }
 0x18a   :  { %v418_v49 = vpack.i.b16 %v391_v44, %v389_v34  ;;  %v421_v53 = vshrl.u32 %v391_v44, 16  ;;  %v492_v59 = vcombine.low %v398_v54, %v414_v48  ;;  %v220_v60 = vshrl.u32 %v197_v45, 16 }
 0x18b   :  { %v432_v2 = vrot.slane %v424_v52, %v3277_v40  ;;  %v493_v26 = vcombine.high %v398_v54, %v414_v48  ;;  %v439_v29 = vrot.slane %v425_v25, %v3277_v40 }
 0x18c   :  { %v440_v55 = vcombine.low %v402_v47, %v418_v49  ;;  %v422_v57 = vpack.i.b16 %v421_v53, %v420_v51  ;;  %v500_v8 = vrot.slane %v492_v59, %v3277_v40  ;;  %v441_v22 = vcombine.high %v402_v47, %v418_v49  ;;  %v3012_v49 = vld [vmem:[#allocation5 + $0x8] ss:$12 sps:$4 sm:$0xff]  }
 0x18d   :  { %v199_v58 = vpop.permute.xlu1 %198  ;;  %v507_v30 = vrot.slane %v493_v26, %v3277_v40  ;;  %v3314_v44 = vpop.permute.xlu0 %194  ;;  %2881 = vmatpush3.bf16.msra.mxu1 %v3012_v49 }
 0x18e   :  { %v3279_v61 = vpack.i.b16 %v199_v58, %v197_v45  ;;  %v221_v62 = vshrl.u32 %v199_v58, 16  ;;  %v508_v1 = vcombine.low %v406_v56, %v422_v57  ;;  %v448_v3 = vrot.slane %v440_v55, %v3277_v40  ;;  %2882 = vmatprep.subr.bf16.mxu1 %v3201_v50  ;;  %v3013_v55 = vld [vmem:[#allocation5 + $0x20] ss:$12 sps:$4 sm:$0xff]  }
 0x18f   :  { %v509_v24 = vcombine.high %v406_v56, %v422_v57  ;;  %v455_v27 = vrot.slane %v441_v22, %v3277_v40  ;;  %v210_v26 = vpack.i.b16 %v3314_v44, %v3267_v23 }
 0x190   :  { %v3286_v4 = vpack.i.b16 %v221_v62, %v220_v60  ;;  %v456_v5 = vcombine.low %v432_v2, %v448_v3  ;;  %v457_v6 = vcombine.high %v432_v2, %v448_v3  ;;  %v516_v11 = vrot.slane %v508_v1, %v3277_v40 }
 0x191   :  { %v523_v28 = vrot.slane %v509_v24, %v3277_v40  ;;  %v472_v32 = vcombine.low %v439_v29, %v455_v27  ;;  %v473_v35 = vcombine.high %v439_v29, %v455_v27  ;;  %v203_v45 = vpop.permute.xlu1 %202  ;;  %v201_v46 = vpop.permute.xlu0 %200  ;;  %2883 = vmatpush3.bf16.msra.mxu1 %v3013_v55  ;;  %v213_v27 = vshrl.u32 %v3314_v44, 16 }
 0x192   :  { %v464_v12 = vrot.slane %v456_v5, %v3282_v63  ;;  %v471_v13 = vrot.slane %v457_v6, %v3282_v63  ;;  %v525_v14 = vcombine.high %v500_v8, %v516_v11  ;;  %v524_v15 = vcombine.low %v500_v8, %v516_v11  ;;  %2894 = vmatprep.subr.bf16.mxu1 %v3201_v50 }
 0x193   :  { %v540_v31 = vcombine.low %v507_v30, %v523_v28  ;;  %v480_v34 = vrot.slane %v472_v32, %v3282_v63  ;;  %v487_v36 = vrot.slane %v473_v35, %v3282_v63  ;;  %v541_v38 = vcombine.high %v507_v30, %v523_v28 }
 0x194   :  { %684 = vxpose.xlu1.c.b16.start.end [1/1] (short) (narrow) %v464_v12, 16  ;;  %748 = vxpose.xlu0.c.b16.start.end [1/1] (short) (narrow) %v471_v13, 16  ;;  %v539_v16 = vrot.slane %v525_v14, %v3282_v63  ;;  %v532_v17 = vrot.slane %v524_v15, %v3282_v63  ;;  %v488_v19 = vcombine.high %v464_v12, %v3191_v0  ;;  %v229_v22 = vshrl.u32 %v203_v45, 16 }
 0x195   :  { %v489_v21 = vcombine.high %v471_v13, %v3191_v0  ;;  %v548_v33 = vrot.slane %v540_v31, %v3282_v63  ;;  %v490_v37 = vcombine.high %v480_v34, %v3191_v0  ;;  %v491_v39 = vcombine.high %v487_v36, %v3191_v0  ;;  %2885 = vmatmul.mubr.msk.bf16.vlgmr.msra.gmra.mrb[0].mxu1 %vm104_vm0, %v3253_v7 }
 0x196   :  { %v556_v18 = vcombine.high %v532_v17, %v3191_v0  ;;  %v557_v20 = vcombine.high %v539_v16, %v3191_v0  ;;  %v555_v41 = vrot.slane %v541_v38, %v3282_v63  ;;  %2896 = vmatprep.mubr.msk.bf16.mxu1 %vm3202_vm1, %v3201_v50  ;;  %v226_v24 = vpack.i.b16 %v203_v45, %v201_v46 }
 0x197   :  { %v558_v42 = vcombine.high %v548_v33, %v3191_v0  ;;  %v228_v25 = vshrl.u32 %v201_v46, 16  ;;  %v212_v29 = vshrl.u32 %v3267_v23, 16 }
 0x198   :  { %764 = vxpose.xlu1.c.b16.start.end [1/1] (short) (narrow) %v539_v16, 16  ;;  %700 = vxpose.xlu0.c.b16.start.end [1/1] (short) (narrow) %v532_v17, 16  ;;  %v559_v43 = vcombine.high %v555_v41, %v3191_v0  ;;  %v240_v31 = vcombine.low %v210_v26, %v226_v24  ;;  %v241_v32 = vcombine.high %v210_v26, %v226_v24 }
 0x199   :  { %v230_v30 = vpack.i.b16 %v229_v22, %v228_v25 }
 0x19c   :  { %732 = vxpose.xlu1.c.b16.start.end [1/1] (short) (narrow) %v556_v18, 16  ;;  %716 = vxpose.xlu0.c.b16.start.end [1/1] (short) (narrow) %v488_v19, 16 }
 0x1a0   :  { %796 = vxpose.xlu1.c.b16.start.end [1/1] (short) (narrow) %v557_v20, 16  ;;  %780 = vxpose.xlu0.c.b16.start.end [1/1] (short) (narrow) %v489_v21, 16 }
 0x1a4   :  { %206 = vrot.lane.b32.xlu1 %v3267_v23, %s3198_s19 }
 0x1a9   :  { %204 = vrot.lane.b32.xlu0 %v3267_v23, %s3196_s17 }
 0x1c7   :  { %1814 = vxpose.xlu1.c.b16.start.end [1/1] (short) (narrow) %v548_v33, 16  ;;  %1798 = vxpose.xlu0.c.b16.start.end [1/1] (short) (narrow) %v480_v34, 16 }
 0x1cb   :  { %1862 = vxpose.xlu1.c.b16.start.end [1/1] (short) (narrow) %v487_v36, 16  ;;  %1830 = vxpose.xlu0.c.b16.start.end [1/1] (short) (narrow) %v490_v37, 16  ;;  %v214_v37 = vpack.i.b16 %v213_v27, %v212_v29 }
 0x1cd   :  { %v308_v44 = vcombine.low %v214_v37, %v230_v30  ;;  %v309_v45 = vcombine.high %v214_v37, %v230_v30 }
 0x1cf   :  { %1894 = vxpose.xlu1.c.b16.start.end [1/1] (short) (narrow) %v491_v39, 16  ;;  %1878 = vxpose.xlu0.c.b16.start.end [1/1] (short) (narrow) %v555_v41, 16 }
 0x1d3   :  { %1846 = vxpose.xlu0.c.b16.start.end [1/1] (short) (narrow) %v558_v42, 16  ;;  %v248_v42 = vrot.slane %v240_v31, %v3277_v40 }
 0x1d7   :  { %1910 = vxpose.xlu0.c.b16.start.end [1/1] (short) (narrow) %v559_v43, 16  ;;  %v255_v43 = vrot.slane %v241_v32, %v3277_v40 }
 0x1fa   :  { %v692_v47 = vpop.trf.xlu1  ;;  %v756_v48 = vpop.trf.xlu0 }
 0x1fb   :  { %v812_v56 = vcombine.low %v692_v47, %v756_v48 }
 0x1fd   :  { %v819_v60 = vrot.slane %v812_v56, %v3277_v40 }
 0x1fe   :  { %v772_v51 = vpop.trf.xlu1  ;;  %v708_v52 = vpop.trf.xlu0 }
 0x1ff   :  { %v837_v57 = vcombine.low %v708_v52, %v772_v51 }
 0x201   :  { %v844_v62 = vrot.slane %v837_v57, %v3277_v40 }
 0x202   :  { %v740_v53 = vpop.trf.xlu1  ;;  %v724_v54 = vpop.trf.xlu0 }
 0x206   :  { %v804_v58 = vpop.trf.xlu1  ;;  %v788_v59 = vpop.trf.xlu0 }
 0x207   :  { %v845_v1 = vcombine.low %v740_v53, %v804_v58  ;;  %v820_v2 = vcombine.low %v724_v54, %v788_v59  ;;  %v323_v54 = vrot.slane %v309_v45, %v3277_v40 }
 0x209   :  { %v852_v3 = vrot.slane %v845_v1, %v3277_v40  ;;  %v827_v5 = vrot.slane %v820_v2, %v3277_v40 }
 0x20b   :  { %v853_v6 = vcombine.low %v844_v62, %v852_v3  ;;  %v828_v8 = vcombine.low %v819_v60, %v827_v5 }
 0x20d   :  { %v860_v11 = vrot.slane %v853_v6, %v3282_v63  ;;  %v835_v12 = vrot.slane %v828_v8, %v3282_v63 }
 0x20f   :  { %v866_v13 = vshrl.u32 %v835_v12, 16  ;;  %v867_v14 = vshrl.u32 %v860_v11, 16  ;;  %v864_v15 = vpack.i.b16 %v860_v11, %v835_v12  ;;  %v836_v16 = vcombine.high %v835_v12, %v3191_v0 }
 0x210   :  { %v861_v7 = vcombine.high %v860_v11, %v3191_v0 }
 0x211   :  { %v868_v17 = vpack.i.b16 %v867_v14, %v866_v13  ;;  %878 = vxpose.xlu1.c.b16.start.end [1/1] (short) (narrow) %v864_v15, 16  ;;  %v874_v18 = vshrl.u32 %v836_v16, 16 }
 0x212   :  { %v875_v19 = vshrl.u32 %v861_v7, 16  ;;  %v872_v20 = vpack.i.b16 %v861_v7, %v836_v16 }
 0x213   :  { %894 = vxpose.xlu0.c.b16.start.end [1/1] (short) (narrow) %v868_v17, 16 }
 0x214   :  { %v876_v21 = vpack.i.b16 %v875_v19, %v874_v18 }
 0x215   :  { %910 = vxpose.xlu1.c.b16.start.end [1/1] (short) (narrow) %v872_v20, 16 }
 0x216   :  { %v207_v28 = vpop.permute.xlu1 %206 }
 0x217   :  { %926 = vxpose.xlu0.c.b16.start.end [1/1] (short) (narrow) %v876_v21, 16  ;;  %v237_v34 = vshrl.u32 %v207_v28, 16 }
 0x21b   :  { %v205_v33 = vpop.permute.xlu0 %204 }
 0x21c   :  { %v234_v35 = vpack.i.b16 %v207_v28, %v205_v33  ;;  %v236_v36 = vshrl.u32 %v205_v33, 16 }
 0x21e   :  { %v238_v38 = vpack.i.b16 %v237_v34, %v236_v36  ;;  %v256_v39 = vcombine.low %v3279_v61, %v234_v35  ;;  %v257_v41 = vcombine.high %v3279_v61, %v234_v35  ;;  %v316_v61 = vrot.slane %v308_v44, %v3277_v40 }
 0x220   :  { %v264_v23 = vrot.slane %v256_v39, %v3277_v40  ;;  %v271_v46 = vrot.slane %v257_v41, %v3277_v40  ;;  %v324_v47 = vcombine.low %v3286_v4, %v238_v38  ;;  %v325_v48 = vcombine.high %v3286_v4, %v238_v38 }
 0x222   :  { %v272_v49 = vcombine.low %v248_v42, %v264_v23  ;;  %v273_v51 = vcombine.high %v248_v42, %v264_v23  ;;  %v288_v52 = vcombine.low %v255_v43, %v271_v46  ;;  %v289_v53 = vcombine.high %v255_v43, %v271_v46 }
 0x223   :  { %v332_v55 = vrot.slane %v324_v47, %v3277_v40  ;;  %v339_v56 = vrot.slane %v325_v48, %v3277_v40 }
 0x224   :  { %v280_v57 = vrot.slane %v272_v49, %v3282_v63  ;;  %v287_v58 = vrot.slane %v273_v51, %v3282_v63  ;;  %v296_v59 = vrot.slane %v288_v52, %v3282_v63  ;;  %v303_v4 = vrot.slane %v289_v53, %v3282_v63 }
 0x225   :  { %v340_v60 = vcombine.low %v316_v61, %v332_v55  ;;  %v341_v62 = vcombine.high %v316_v61, %v332_v55  ;;  %v356_v1 = vcombine.low %v323_v54, %v339_v56  ;;  %v357_v2 = vcombine.high %v323_v54, %v339_v56 }
 0x226   :  { %v592_v3 = vcombine.low %v280_v57, %v287_v58  ;;  %v2825_v5 = vcombine.high %v280_v57, %v287_v58  ;;  %v1706_v6 = vcombine.low %v296_v59, %v303_v4  ;;  %v2835_v8 = vcombine.high %v296_v59, %v303_v4 }
 0x227   :  { %v348_v11 = vrot.slane %v340_v60, %v3282_v63  ;;  %v355_v12 = vrot.slane %v341_v62, %v3282_v63  ;;  %v364_v13 = vrot.slane %v356_v1, %v3282_v63  ;;  %v371_v14 = vrot.slane %v357_v2, %v3282_v63 }
 0x228   :  { %v599_v15 = vrot.slane %v592_v3, %v3277_v40  ;;  %v607_v16 = vrot.slane %v2825_v5, %v3277_v40  ;;  %v1713_v7 = vrot.slane %v1706_v6, %v3277_v40  ;;  %v1721_v17 = vrot.slane %v2835_v8, %v3277_v40 }
 0x229   :  { %v626_v18 = vcombine.low %v348_v11, %v355_v12  ;;  %v2826_v19 = vcombine.high %v348_v11, %v355_v12  ;;  %v1740_v20 = vcombine.low %v364_v13, %v371_v14  ;;  %v2836_v21 = vcombine.high %v364_v13, %v371_v14 }
 0x22a   :  { %v608_v22 = vcombine.low %v599_v15, %v607_v16  ;;  %v609_v24 = vcombine.high %v599_v15, %v607_v16  ;;  %v1722_v25 = vcombine.low %v1713_v7, %v1721_v17  ;;  %v1723_v26 = vcombine.high %v1713_v7, %v1721_v17 }
 0x22b   :  { %v633_v27 = vrot.slane %v626_v18, %v3277_v40  ;;  %v641_v28 = vrot.slane %v2826_v19, %v3277_v40  ;;  %v1747_v29 = vrot.slane %v1740_v20, %v3277_v40  ;;  %v1755_v30 = vrot.slane %v2836_v21, %v3277_v40 }
 0x22c   :  { %v3369_v31 = vrot.slane %v608_v22, %v3282_v63  ;;  %v3372_v32 = vrot.slane %v609_v24, %v3282_v63  ;;  %v3375_v33 = vrot.slane %v1722_v25, %v3282_v63  ;;  %v3383_v43 = vrot.slane %v1723_v26, %v3282_v63 }
 0x22d   :  { %v642_v34 = vcombine.low %v633_v27, %v641_v28  ;;  %v643_v35 = vcombine.high %v633_v27, %v641_v28  ;;  %v1756_v36 = vcombine.low %v1747_v29, %v1755_v30  ;;  %v1757_v37 = vcombine.high %v1747_v29, %v1755_v30  ;;  %v1822_v38 = vpop.trf.xlu1  ;;  %v1806_v39 = vpop.trf.xlu0 }
 0x22e   :  { %v663_v41 = vshrl.u32 %v3369_v31, 16  ;;  %v3380_v42 = vcombine.high %v3369_v31, %v3191_v0  ;;  %v675_v23 = vshrl.u32 %v3372_v32, 16  ;;  %v3398_v48 = vcombine.high %v3372_v32, %v3191_v0 }
 0x22f   :  { %v3386_v44 = vrot.slane %v642_v34, %v3282_v63  ;;  %v3389_v45 = vrot.slane %v643_v35, %v3282_v63  ;;  %v3393_v46 = vrot.slane %v1756_v36, %v3282_v63  ;;  %v1777_v49 = vshrl.u32 %v3375_v33, 16 }
 0x230   :  { %v669_v47 = vshrl.u32 %v3380_v42, 16  ;;  %v3403_v51 = vcombine.high %v3375_v33, %v3191_v0  ;;  %v3422_v4 = vrot.slane %v1757_v37, %v3282_v63  ;;  %v681_v6 = vshrl.u32 %v3398_v48, 16 }
 0x231   :  { %v1870_v52 = vpop.trf.xlu1  ;;  %v1838_v53 = vpop.trf.xlu0  ;;  %v662_v61 = vpack.i.b16 %v3386_v44, %v3369_v31  ;;  %v664_v54 = vshrl.u32 %v3386_v44, 16  ;;  %v3410_v55 = vcombine.high %v3386_v44, %v3191_v0  ;;  %v674_v56 = vpack.i.b16 %v3389_v45, %v3372_v32 }
 0x232   :  { %v676_v57 = vshrl.u32 %v3389_v45, 16  ;;  %v3417_v58 = vcombine.high %v3389_v45, %v3191_v0  ;;  %v1776_v59 = vpack.i.b16 %v3393_v46, %v3375_v33  ;;  %v1778_v2 = vshrl.u32 %v3393_v46, 16 }
 0x233   :  { %v3424_v60 = vpack.i.b16 %v664_v54, %v663_v41  ;;  %v668_v62 = vpack.i.b16 %v3410_v55, %v3380_v42  ;;  %v670_v1 = vshrl.u32 %v3410_v55, 16  ;;  %v1926_v11 = vcombine.low %v1806_v39, %v1870_v52 }
 0x234   :  { %v3430_v3 = vpack.i.b16 %v676_v57, %v675_v23  ;;  %v680_v5 = vpack.i.b16 %v3417_v58, %v3398_v48  ;;  %v682_v8 = vshrl.u32 %v3417_v58, 16  ;;  %v3438_v15 = vpack.i.b16 %v1778_v2, %v1777_v49 }
 0x235   :  { %v1902_v12 = vpop.trf.xlu1  ;;  %v1886_v13 = vpop.trf.xlu0  ;;  %v3436_v14 = vpack.i.b16 %v670_v1, %v669_v47  ;;  %v3442_v16 = vcombine.high %v3393_v46, %v3191_v0  ;;  %v1783_v18 = vshrl.u32 %v3403_v51, 16  ;;  %v1788_v19 = vpack.i.b16 %v3422_v4, %v3383_v43 }
 0x236   :  { %v1934_v7 = vcombine.low %v1838_v53, %v1902_v12  ;;  %v3444_v17 = vpack.i.b16 %v682_v8, %v681_v6  ;;  %v1789_v22 = vshrl.u32 %v3383_v43, 16  ;;  %v1790_v24 = vshrl.u32 %v3422_v4, 16 }
 0x237   :  { %v1782_v20 = vpack.i.b16 %v3442_v16, %v3403_v51  ;;  %v1784_v21 = vshrl.u32 %v3442_v16, 16  ;;  %v3456_v25 = vcombine.high %v3383_v43, %v3191_v0  ;;  %v3460_v26 = vcombine.high %v3422_v4, %v3191_v0 }
 0x238   :  { %v1941_v27 = vrot.slane %v1934_v7, %v3277_v40  ;;  %v3465_v30 = vpack.i.b16 %v1790_v24, %v1789_v22  ;;  %v1933_v37 = vrot.slane %v1926_v11, %v3277_v40  ;;  %v1951_v39 = vcombine.low %v1822_v38, %v1886_v13 }
 0x239   :  { %v1854_v28 = vpop.trf.xlu0  ;;  %v3463_v29 = vpack.i.b16 %v1784_v21, %v1783_v18  ;;  %v1794_v34 = vpack.i.b16 %v3460_v26, %v3456_v25  ;;  %v1795_v35 = vshrl.u32 %v3456_v25, 16  ;;  %v1796_v36 = vshrl.u32 %v3460_v26, 16 }
 0x23a   :  { %v1942_v23 = vcombine.low %v1933_v37, %v1941_v27  ;;  %v1958_v52 = vrot.slane %v1951_v39, %v3277_v40 }
 0x23b   :  { %v3472_v41 = vpack.i.b16 %v1796_v36, %v1795_v35 }
 0x23c   :  { %v1949_v54 = vrot.slane %v1942_v23, %v3282_v63 }
 0x23d   :  { %v1918_v47 = vpop.trf.xlu0 }
 0x23e   :  { %v1959_v49 = vcombine.low %v1854_v28, %v1918_v47  ;;  %v1980_v2 = vshrl.u32 %v1949_v54, 16  ;;  %v1950_v11 = vcombine.high %v1949_v54, %v3191_v0 }
 0x240   :  { %v1966_v53 = vrot.slane %v1959_v49, %v3277_v40  ;;  %v1988_v18 = vshrl.u32 %v1950_v11, 16 }
 0x242   :  { %v1967_v57 = vcombine.low %v1958_v52, %v1966_v53 }
 0x244   :  { %v1974_v1 = vrot.slane %v1967_v57, %v3282_v63 }
 0x246   :  { %v1978_v6 = vpack.i.b16 %v1974_v1, %v1949_v54  ;;  %v1981_v8 = vshrl.u32 %v1974_v1, 16  ;;  %v1975_v38 = vcombine.high %v1974_v1, %v3191_v0 }
 0x248   :  { %1992 = vxpose.xlu1.c.b16.start.end [1/1] (short) (narrow) %v1978_v6, 16  ;;  %v1982_v12 = vpack.i.b16 %v1981_v8, %v1980_v2  ;;  %v1989_v13 = vshrl.u32 %v1975_v38, 16  ;;  %v1986_v7 = vpack.i.b16 %v1975_v38, %v1950_v11 }
 0x24a   :  { %2008 = vxpose.xlu0.c.b16.start.end [1/1] (short) (narrow) %v1982_v12, 16  ;;  %v1990_v21 = vpack.i.b16 %v1989_v13, %v1988_v18 }
 0x24c   :  { %2024 = vxpose.xlu1.c.b16.start.end [1/1] (short) (narrow) %v1986_v7, 16 }
 0x24e   :  { %2040 = vxpose.xlu0.c.b16.start.end [1/1] (short) (narrow) %v1990_v21, 16 }
 0x268   :  { %v3608_v43 = vpop.f32.mrb[0].mxu1 }
 0x269   :  { %v2886_v4 = vpop.f32.mrb[1].mxu1 }
 0x277   :  { %v886_v22 = vpop.trf.xlu1 }
 0x278   :  { %v948_v27 = vrot.slane %v886_v22, %v3277_v40 }
 0x279   :  { %v902_v24 = vpop.trf.xlu0 }
 0x27a   :  { %v980_v35 = vrot.slane %v902_v24, %v3277_v40 }
 0x27b   :  { %v918_v28 = vpop.trf.xlu1 }
 0x27c   :  { %v955_v36 = vrot.slane %v918_v28, %v3277_v40 }
 0x27d   :  { %v934_v37 = vpop.trf.xlu0 }
 0x27e   :  { %v956_v39 = vcombine.low %v948_v27, %v955_v36  ;;  %v987_v23 = vrot.slane %v934_v37, %v3277_v40  ;;  %v957_v52 = vcombine.high %v948_v27, %v955_v36 }
 0x280   :  { %v964_v47 = vrot.slane %v956_v39, %v3282_v63  ;;  %v988_v49 = vcombine.low %v980_v35, %v987_v23  ;;  %v989_v53 = vcombine.high %v980_v35, %v987_v23  ;;  %v971_v38 = vrot.slane %v957_v52, %v3282_v63 }
 0x282   :  { %v996_v54 = vrot.slane %v988_v49, %v3282_v63  ;;  %v1009_v57 = vshrl.u32 %v964_v47, 16  ;;  %v972_v1 = vcombine.high %v964_v47, %v3191_v0  ;;  %v1003_v12 = vrot.slane %v989_v53, %v3282_v63 }
 0x283   :  { %v1021_v35 = vshrl.u32 %v971_v38, 16  ;;  %v973_v44 = vcombine.high %v971_v38, %v3191_v0 }
 0x284   :  { %v1008_v2 = vpack.i.b16 %v996_v54, %v964_v47  ;;  %v1010_v6 = vshrl.u32 %v996_v54, 16  ;;  %v1004_v8 = vcombine.high %v996_v54, %v3191_v0  ;;  %v1015_v11 = vshrl.u32 %v972_v1, 16 }
 0x285   :  { %v1022_v36 = vshrl.u32 %v1003_v12, 16  ;;  %v1020_v37 = vpack.i.b16 %v1003_v12, %v971_v38  ;;  %v1027_v23 = vshrl.u32 %v973_v44, 16 }
 0x286   :  { %v1036_v13 = vsel %vm1034_vm2, %v1008_v2, 0  ;;  %v1011_v7 = vpack.i.b16 %v1010_v6, %v1009_v57  ;;  %v1014_v18 = vpack.i.b16 %v1004_v8, %v972_v1  ;;  %v1016_v21 = vshrl.u32 %v1004_v8, 16 }
 0x287   :  { %2889 = vmatpush3.bf16.msra.mxu0 %v1036_v13  ;;  %v1023_v31 = vpack.i.b16 %v1022_v36, %v1021_v35  ;;  %v1220_v39 = vsel %vm1034_vm2, %v1020_v37, 0 }
 0x288   :  { %v1082_v22 = vsel %vm1034_vm2, %v1011_v7, 0  ;;  %2900 = vmatprep.subr.bf16.mxu0 %v3201_v50  ;;  %v1128_v24 = vsel %vm1034_vm2, %v1014_v18, 0  ;;  %v1017_v27 = vpack.i.b16 %v1016_v21, %v1015_v11 }
 0x289   :  { %2895 = vmatpush3.bf16.msra.mxu1 %v1082_v22 }
 0x28a   :  { %2891 = vmatmul.mubr.msk.bf16.vlgmr.msra.gmra.mrb[4].mxu0 %vm1030_vm3, %v662_v61  ;;  %2906 = vmatprep.subr.bf16.mxu1 %v3201_v50  ;;  %v1174_v28 = vsel %vm1034_vm2, %v1017_v27, 0  ;;  %v1005_v61 = vcombine.high %v1003_v12, %v3191_v0 }
 0x28b   :  { %2901 = vmatpush3.bf16.msra.mxu0 %v1128_v24  ;;  %2902 = vmatprep.mubr.msk.bf16.mxu0 %vm3202_vm1, %v3201_v50 }
 0x28c   :  { %2897 = vmatmul.mubr.msk.bf16.vlgmr.msra.gmra.mrb[4].mxu1 %vm1030_vm3, %v3424_v60  ;;  %2912 = vmatprep.subr.bf16.mxu0 %v3201_v50  ;;  %v1266_v60 = vsel %vm1034_vm2, %v1023_v31, 0  ;;  %v1028_v47 = vshrl.u32 %v1005_v61, 16  ;;  %v1026_v49 = vpack.i.b16 %v1005_v61, %v973_v44 }
 0x28d   :  { %2907 = vmatpush3.bf16.msra.mxu1 %v1174_v28  ;;  %2908 = vmatprep.mubr.msk.bf16.mxu1 %vm3202_vm1, %v3201_v50 }
 0x28e   :  { %2918 = vmatprep.subr.bf16.mxu1 %v3201_v50  ;;  %v1029_v42 = vpack.i.b16 %v1028_v47, %v1027_v23  ;;  %v1312_v55 = vsel %vm1034_vm2, %v1026_v49, 0 }
 0x292   :  { %2903 = vmatmul.mubr.msk.bf16.vlgmr.msra.gmra.mrb[8].mxu0 %vm1030_vm3, %v668_v62  ;;  %v1358_v62 = vsel %vm1034_vm2, %v1029_v42, 0 }
 0x293   :  { %2913 = vmatpush3.bf16.msra.mxu0 %v1220_v39  ;;  %2914 = vmatprep.mubr.msk.bf16.mxu0 %vm3202_vm1, %v3201_v50 }
 0x294   :  { %2909 = vmatmul.mubr.msk.bf16.vlgmr.msra.gmra.mrb[8].mxu1 %vm1030_vm3, %v3436_v14  ;;  %2924 = vmatprep.subr.bf16.mxu0 %v3201_v50 }
 0x295   :  { %2919 = vmatpush3.bf16.msra.mxu1 %v1266_v60  ;;  %2920 = vmatprep.mubr.msk.bf16.mxu1 %vm3202_vm1, %v3201_v50 }
 0x296   :  { %2930 = vmatprep.subr.bf16.mxu1 %v3201_v50 }
 0x29a   :  { %2915 = vmatmul.mubr.msk.bf16.vlgmr.msra.gmra.mrb[12].mxu0 %vm1030_vm3, %v674_v56 }
 0x29b   :  { %2925 = vmatpush3.bf16.msra.mxu0 %v1312_v55  ;;  %2926 = vmatprep.mubr.msk.bf16.mxu0 %vm3202_vm1, %v3201_v50 }
 0x29c   :  { %2921 = vmatmul.mubr.msk.bf16.vlgmr.msra.gmra.mrb[12].mxu1 %vm1030_vm3, %v3430_v3  ;;  %2936 = vmatprep.subr.bf16.mxu0 %v3201_v50 }
 0x29d   :  { %2931 = vmatpush3.bf16.msra.mxu1 %v1358_v62  ;;  %2932 = vmatprep.mubr.msk.bf16.mxu1 %vm3202_vm1, %v3201_v50 }
 0x29e   :  { %2942 = vmatprep.subr.bf16.mxu1 %v3201_v50 }
 0x2a2   :  { %2927 = vmatmul.mubr.msk.bf16.vlgmr.msra.gmra.mrb[16].mxu0 %vm1030_vm3, %v680_v5 }
 0x2a3   :  { %2938 = vmatprep.mubr.msk.bf16.mxu0 %vm3202_vm1, %v3201_v50 }
 0x2a4   :  { %2933 = vmatmul.mubr.msk.bf16.vlgmr.msra.gmra.mrb[16].mxu1 %vm1030_vm3, %v3444_v17 }
 0x2a5   :  { %2944 = vmatprep.mubr.msk.bf16.mxu1 %vm3202_vm1, %v3201_v50 }
 0x2ae   :  { %v2000_v32 = vpop.trf.xlu1 }
 0x2af   :  { %v2062_v3 = vrot.slane %v2000_v32, %v3277_v40 }
 0x2b0   :  { %v2016_v45 = vpop.trf.xlu0 }
 0x2b1   :  { %v2094_v48 = vrot.slane %v2016_v45, %v3277_v40 }
 0x2b2   :  { %v2032_v56 = vpop.trf.xlu1 }
 0x2b3   :  { %v2069_v14 = vrot.slane %v2032_v56, %v3277_v40 }
 0x2b4   :  { %v2048_v52 = vpop.trf.xlu0 }
 0x2b5   :  { %v2070_v58 = vcombine.low %v2062_v3, %v2069_v14  ;;  %v2101_v5 = vrot.slane %v2048_v52, %v3277_v40  ;;  %v2071_v38 = vcombine.high %v2062_v3, %v2069_v14 }
 0x2b7   :  { %v2078_v53 = vrot.slane %v2070_v58, %v3282_v63  ;;  %v2102_v54 = vcombine.low %v2094_v48, %v2101_v5  ;;  %v2103_v1 = vcombine.high %v2094_v48, %v2101_v5  ;;  %v2085_v27 = vrot.slane %v2071_v38, %v3282_v63 }
 0x2b9   :  { %v2110_v17 = vrot.slane %v2102_v54, %v3282_v63  ;;  %v2086_v57 = vcombine.high %v2078_v53, %v3191_v0  ;;  %v2123_v6 = vshrl.u32 %v2078_v53, 16  ;;  %v2117_v21 = vrot.slane %v2103_v1, %v3282_v63 }
 0x2ba   :  { %v2135_v46 = vshrl.u32 %v2085_v27, 16  ;;  %v2087_v37 = vcombine.high %v2085_v27, %v3191_v0 }
 0x2bb   :  { %v2122_v2 = vpack.i.b16 %v2110_v17, %v2078_v53  ;;  %v2124_v8 = vshrl.u32 %v2110_v17, 16  ;;  %v2118_v11 = vcombine.high %v2110_v17, %v3191_v0  ;;  %v2129_v12 = vshrl.u32 %v2086_v57, 16 }
 0x2bc   :  { %v2136_v63 = vshrl.u32 %v2117_v21, 16  ;;  %v2134_v33 = vpack.i.b16 %v2117_v21, %v2085_v27  ;;  %v2119_v36 = vcombine.high %v2117_v21, %v3191_v0  ;;  %v2141_v16 = vshrl.u32 %v2087_v37, 16 }
 0x2bd   :  { %v2148_v13 = vsel %vm1034_vm2, %v2122_v2, 0  ;;  %v2125_v7 = vpack.i.b16 %v2124_v8, %v2123_v6  ;;  %v2128_v18 = vpack.i.b16 %v2118_v11, %v2086_v57  ;;  %v2130_v40 = vshrl.u32 %v2118_v11, 16 }
 0x2be   :  { %2937 = vmatpush3.bf16.msra.mxu0 %v2148_v13  ;;  %v2142_v44 = vshrl.u32 %v2119_v36, 16  ;;  %v2140_v51 = vpack.i.b16 %v2119_v36, %v2087_v37 }
 0x2bf   :  { %v2194_v22 = vsel %vm1034_vm2, %v2125_v7, 0  ;;  %2948 = vmatprep.subr.bf16.mxu0 %v3201_v50  ;;  %v2131_v24 = vpack.i.b16 %v2130_v40, %v2129_v12  ;;  %v2240_v28 = vsel %vm1034_vm2, %v2128_v18, 0 }
 0x2c0   :  { %2943 = vmatpush3.bf16.msra.mxu1 %v2194_v22 }
 0x2c1   :  { %2939 = vmatmul.mubr.msk.bf16.vlgmr.msra.gmra.mrb[20].mxu0 %vm1030_vm3, %v1776_v59  ;;  %2954 = vmatprep.subr.bf16.mxu1 %v3201_v50  ;;  %v2286_v35 = vsel %vm1034_vm2, %v2131_v24, 0  ;;  %v2137_v59 = vpack.i.b16 %v2136_v63, %v2135_v46 }
 0x2c2   :  { %2949 = vmatpush3.bf16.msra.mxu0 %v2240_v28  ;;  %2950 = vmatprep.mubr.msk.bf16.mxu0 %vm3202_vm1, %v3201_v50 }
 0x2c3   :  { %2945 = vmatmul.mubr.msk.bf16.vlgmr.msra.gmra.mrb[20].mxu1 %vm1030_vm3, %v3438_v15  ;;  %2960 = vmatprep.subr.bf16.mxu0 %v3201_v50  ;;  %v2332_v15 = vsel %vm1034_vm2, %v2134_v33, 0  ;;  %v2378_v31 = vsel %vm1034_vm2, %v2137_v59, 0 }
 0x2c4   :  { %2955 = vmatpush3.bf16.msra.mxu1 %v2286_v35  ;;  %2956 = vmatprep.mubr.msk.bf16.mxu1 %vm3202_vm1, %v3201_v50 }
 0x2c5   :  { %2966 = vmatprep.subr.bf16.mxu1 %v3201_v50 }
 0x2c9   :  { %2951 = vmatmul.mubr.msk.bf16.vlgmr.msra.gmra.mrb[24].mxu0 %vm1030_vm3, %v1782_v20  ;;  %v2143_v20 = vpack.i.b16 %v2142_v44, %v2141_v16 }
 0x2ca   :  { %2961 = vmatpush3.bf16.msra.mxu0 %v2332_v15  ;;  %2962 = vmatprep.mubr.msk.bf16.mxu0 %vm3202_vm1, %v3201_v50 }
 0x2cb   :  { %2957 = vmatmul.mubr.msk.bf16.vlgmr.msra.gmra.mrb[24].mxu1 %vm1030_vm3, %v3463_v29  ;;  %2972 = vmatprep.subr.bf16.mxu0 %v3201_v50  ;;  %v2424_v29 = vsel %vm1034_vm2, %v2140_v51, 0  ;;  %v2470_v61 = vsel %vm1034_vm2, %v2143_v20, 0 }
 0x2cc   :  { %2967 = vmatpush3.bf16.msra.mxu1 %v2378_v31  ;;  %2968 = vmatprep.mubr.msk.bf16.mxu1 %vm3202_vm1, %v3201_v50 }
 0x2cd   :  { %2978 = vmatprep.subr.bf16.mxu1 %v3201_v50 }
 0x2d1   :  { %2963 = vmatmul.mubr.msk.bf16.vlgmr.msra.gmra.mrb[28].mxu0 %vm1030_vm3, %v1788_v19  ;;  %v3612_v19 = vpop.f32.mrb[2].mxu1 }
 0x2d2   :  { %2973 = vmatpush3.bf16.msra.mxu0 %v2424_v29  ;;  %2974 = vmatprep.mubr.msk.bf16.mxu0 %vm3202_vm1, %v3201_v50 }
 0x2d3   :  { %2969 = vmatmul.mubr.msk.bf16.vlgmr.msra.gmra.mrb[28].mxu1 %vm1030_vm3, %v3465_v30  ;;  %v2887_v30 = vpop.f32.mrb[3].mxu1 }
 0x2d4   :  { %2979 = vmatpush3.bf16.msra.mxu1 %v2470_v61  ;;  %2980 = vmatprep.mubr.msk.bf16.mxu1 %vm3202_vm1, %v3201_v50 }
 0x2d9   :  { %2975 = vmatmul.mubr.msk.bf16.vlgmr.msra.gmra.mrb[32].mxu0 %vm1030_vm3, %v1794_v34 }
 0x2db   :  { %2981 = vmatmul.mubr.msk.bf16.vlgmr.msra.gmra.mrb[32].mxu1 %vm1030_vm3, %v3472_v41 }
 0x35d   :  { %v3614_v39 = vpop.f32.mrb[4].mxu0 }
 0x35e   :  { %v2892_v60 = vpop.f32.mrb[5].mxu0  ;;  %v1401_v50 = vsel %vm1400_vm4, %v3614_v39, -inf }
 0x35f   :  { %v3618_v23 = vpop.f32.mrb[4].mxu1  ;;  %1402 = vmax.xlane.f32.xlu1 %v1401_v50  ;;  %v1075_v25 = vpop.f32.mrb[6].mxu0 }
 0x360   :  { %v2893_v26 = vpop.f32.mrb[7].mxu0  ;;  %v2898_v34 = vpop.f32.mrb[5].mxu1  ;;  %v1404_v41 = vsel %vm1400_vm4, %v3618_v23, -inf }
 0x361   :  { %1405 = vmax.xlane.f32.xlu0 %v1404_v41  ;;  %v1121_v47 = vpop.f32.mrb[6].mxu1 }
 0x362   :  { %v2899_v49 = vpop.f32.mrb[7].mxu1 }
 0x365   :  { %v3622_v42 = vpop.f32.mrb[8].mxu0 }
 0x366   :  { %v2904_v55 = vpop.f32.mrb[9].mxu0  ;;  %v1407_v62 = vsel %vm1400_vm4, %v3622_v42, -inf }
 0x367   :  { %v3626_v32 = vpop.f32.mrb[8].mxu1  ;;  %1408 = vmax.xlane.f32.xlu1 %v1407_v62  ;;  %v1167_v45 = vpop.f32.mrb[10].mxu0 }
 0x368   :  { %v2905_v56 = vpop.f32.mrb[11].mxu0  ;;  %v2910_v3 = vpop.f32.mrb[9].mxu1  ;;  %v1410_v48 = vsel %vm1400_vm4, %v3626_v32, -inf }
 0x369   :  { %v1213_v14 = vpop.f32.mrb[10].mxu1 }
 0x36a   :  { %v2911_v52 = vpop.f32.mrb[11].mxu1 }
 0x36b   :  { %1411 = vmax.xlane.f32.xlu1 %v1410_v48 }
 0x36d   :  { %v3630_v58 = vpop.f32.mrb[12].mxu0 }
 0x36e   :  { %v2916_v5 = vpop.f32.mrb[13].mxu0  ;;  %v1413_v53 = vsel %vm1400_vm4, %v3630_v58, -inf }
 0x36f   :  { %v3634_v54 = vpop.f32.mrb[12].mxu1  ;;  %1414 = vmax.xlane.f32.xlu1 %v1413_v53  ;;  %v1259_v17 = vpop.f32.mrb[14].mxu0 }
 0x370   :  { %v2917_v57 = vpop.f32.mrb[15].mxu0  ;;  %v2922_v1 = vpop.f32.mrb[13].mxu1  ;;  %v1416_v8 = vsel %vm1400_vm4, %v3634_v54, -inf }
 0x371   :  { %v1305_v2 = vpop.f32.mrb[14].mxu1 }
 0x372   :  { %v2923_v6 = vpop.f32.mrb[15].mxu1  ;;  %v67_v2 = vsub.s32 2, %v3257_v9 }
 0x373   :  { %1417 = vmax.xlane.f32.xlu1 %v1416_v8  ;;  %v3110_v6 = vld [vmem:[%s3953_s2] sm:$0x7]  ;;  %s3204_s2 = smov [#allocation7]  }
 0x374   :  { %v68_v8 = vrot.slane %v3110_v6, %v67_v2  ;;  %s2804_s24 = sshll.u32 %s3204_s2, 4  ;;  %s2805_s24 = int_to_ptr.vmem [resolvable:$true] %s2804_s24 }
 0x375   :  { %v3638_v11 = vpop.f32.mrb[16].mxu0  ;;  %s3157_s25 = scalar_lea.vmem %s2805_s24, 256  ;;  %p3162_p3 = scmp.lt.s32.totalorder %s2805_s24, %s2805_s24 }
 0x376   :  { %v2928_v38 = vpop.f32.mrb[17].mxu0  ;;  %v1419_v12 = vsel %vm1400_vm4, %v3638_v11, -inf  ;;  %p3158_p2 = scmp.ne.s32.totalorder %s2805_s24, %s3157_s25  ;;  %p3163_p4 = scmp.lt.s32.totalorder %s3157_s25, %s3157_s25 }
 0x377   :  { %v3642_v13 = vpop.f32.mrb[16].mxu1  ;;  %1420 = vmax.xlane.f32.xlu1 %v1419_v12  ;;  %v1351_v7 = vpop.f32.mrb[18].mxu0  ;;  %v186_v38 = vadd.f32 %v3608_v43, %v68_v8  ;;  %v189_v12 = vadd.f32 %v3612_v19, %v68_v8 }
 0x378   :  { %v2929_v18 = vpop.f32.mrb[19].mxu0  ;;  %v2934_v40 = vpop.f32.mrb[17].mxu1  ;;  %v1422_v24 = vsel %vm1400_vm4, %v3642_v13, -inf  ;;  %p3164_p5 = por %p3163_p4, %p3162_p3 }
 0x379   :  { %v1397_v21 = vpop.f32.mrb[18].mxu1 }
 0x37a   :  { %v2935_v22 = vpop.f32.mrb[19].mxu1  ;;  %p3165_p6 = pnand %p3164_p5, %p3158_p2 }
 0x37b   :  { %1423 = vmax.xlane.f32.xlu1 %v1422_v24 }
 0x394   :  { %v3646_v27 = vpop.f32.mrb[20].mxu0 }
 0x395   :  { %v2940_v28 = vpop.f32.mrb[21].mxu0  ;;  %v2512_v35 = vsel %vm1400_vm4, %v3646_v27, -inf }
 0x396   :  { %v3650_v63 = vpop.f32.mrb[20].mxu1  ;;  %2513 = vmax.xlane.f32.xlu1 %v2512_v35  ;;  %v2187_v33 = vpop.f32.mrb[22].mxu0 }
 0x397   :  { %v2941_v46 = vpop.f32.mrb[23].mxu0  ;;  %v2946_v59 = vpop.f32.mrb[21].mxu1  ;;  %v2515_v36 = vsel %vm1400_vm4, %v3650_v63, -inf }
 0x398   :  { %2516 = vmax.xlane.f32.xlu0 %v2515_v36  ;;  %v2233_v15 = vpop.f32.mrb[22].mxu1 }
 0x399   :  { %v2947_v37 = vpop.f32.mrb[23].mxu1 }
 0x39c   :  { %v3654_v31 = vpop.f32.mrb[24].mxu0 }
 0x39d   :  { %v2952_v44 = vpop.f32.mrb[25].mxu0  ;;  %v2518_v51 = vsel %vm1400_vm4, %v3654_v31, -inf }
 0x39e   :  { %v3658_v16 = vpop.f32.mrb[24].mxu1  ;;  %2519 = vmax.xlane.f32.xlu0 %v2518_v51  ;;  %v2279_v20 = vpop.f32.mrb[26].mxu0 }
 0x39f   :  { %v2953_v29 = vpop.f32.mrb[27].mxu0  ;;  %v2958_v61 = vpop.f32.mrb[25].mxu1  ;;  %v2521_v60 = vsel %vm1400_vm4, %v3658_v16, -inf  ;;  %v3203_v20 = vmov 1966171168  }
 0x3a0   :  { %v2325_v4 = vpop.f32.mrb[26].mxu1  ;;  %v1524_v29 = vunpack.c.l.s4 %v3203_v20 }
 0x3a1   :  { %v2959_v30 = vpop.f32.mrb[27].mxu1 }
 0x3a2   :  { %2522 = vmax.xlane.f32.xlu0 %v2521_v60 }
 0x3a4   :  { %v3662_v50 = vpop.f32.mrb[28].mxu0 }
 0x3a5   :  { %v2964_v25 = vpop.f32.mrb[29].mxu0  ;;  %v2524_v26 = vsel %vm1400_vm4, %v3662_v50, -inf }
 0x3a6   :  { %v3666_v34 = vpop.f32.mrb[28].mxu1  ;;  %2525 = vmax.xlane.f32.xlu0 %v2524_v26  ;;  %v2371_v41 = vpop.f32.mrb[30].mxu0  ;;  %v1525_v26 = vunpack.c.0.s8 %v1524_v29 }
 0x3a7   :  { %v2965_v47 = vpop.f32.mrb[31].mxu0  ;;  %v2970_v49 = vpop.f32.mrb[29].mxu1  ;;  %v2527_v45 = vsel %vm1400_vm4, %v3666_v34, -inf }
 0x3a8   :  { %v2417_v55 = vpop.f32.mrb[30].mxu1 }
 0x3a9   :  { %v2971_v62 = vpop.f32.mrb[31].mxu1 }
 0x3aa   :  { %2528 = vmax.xlane.f32.xlu0 %v2527_v45  ;;  %v3735_v62 = vsub.s32 %v1525_v26, %v3257_v9 }
 0x3ac   :  { %v3670_v56 = vpop.f32.mrb[32].mxu0 }
 0x3ad   :  { %v2976_v3 = vpop.f32.mrb[33].mxu0  ;;  %v2530_v14 = vsel %vm1400_vm4, %v3670_v56, -inf }
 0x3ae   :  { %v3674_v52 = vpop.f32.mrb[32].mxu1  ;;  %2531 = vmax.xlane.f32.xlu0 %v2530_v14  ;;  %v2463_v48 = vpop.f32.mrb[34].mxu0 }
 0x3af   :  { %v2977_v5 = vpop.f32.mrb[35].mxu0  ;;  %v2982_v53 = vpop.f32.mrb[33].mxu1  ;;  %v2533_v1 = vsel %vm1400_vm4, %v3674_v52, -inf }
 0x3b0   :  { %v2509_v17 = vpop.f32.mrb[34].mxu1 }
 0x3b1   :  { %v2983_v57 = vpop.f32.mrb[35].mxu1 }
 0x3b2   :  { %2534 = vmax.xlane.f32.xlu0 %v2533_v1 }
 0x3c9   :  { %560 = vxpose.xlu1.b32.start.end [1/1] (short) (narrow) %v186_v38, 8 }
 0x3df   :  { %1674 = vxpose.xlu0.b32.start.end [1/1] (short) (narrow) %v189_v12, 8 }
 0x3e7   :  { %3004 = vset.pattern.permute.xlu1 %v3191_v0 }
 0x3ec   :  { %v3687_v18 = vpop.xlane.xlu1 %1402 }
 0x3ed   :  { %v1425_v22 = vmax.f32 %v3687_v18, -1e+30 }
 0x3ee   :  { %v3685_v7 = vpop.xlane.xlu0 %1405 }
 0x3ef   :  { %v1426_v40 = vmax.f32 %v3685_v7, -1e+30  ;;  %v1457_v43 = vsub.f32 %v3614_v39, %v1425_v22 }
 0x3f1   :  { %v1458_v21 = vsub.f32 %v3618_v23, %v1426_v40  ;;  %v1465_v19 = vmul.f32 1.442695, %v1457_v43 }
 0x3f3   :  { %v1467_v24 = vmul.f32 1.442695, %v1458_v21 }
 0x3f4   :  { %v3700_v23 = vpop.xlane.xlu1 %1408 }
 0x3f5   :  { %3014 = vpow2.f32 %v1467_v24 }
 0x3f6   :  { %3016 = vpow2.f32 %v1465_v19 }
 0x3f8   :  { %v3702_v59 = vpop.xlane.xlu1 %1411 }
 0x3f9   :  { %v1428_v25 = vmax.f32 %v3702_v59, -1e+30 }
 0x3fb   :  { %v1460_v55 = vsub.f32 %v3626_v32, %v1428_v25 }
 0x3fc   :  { %v3704_v36 = vpop.xlane.xlu1 %1414 }
 0x3fd   :  { %v1471_v14 = vmul.f32 1.442695, %v1460_v55  ;;  %v1429_v48 = vmax.f32 %v3704_v36, -1e+30 }
 0x3ff   :  { %v3015_v28 = vpop.eup %3014  ;;  %v1461_v9 = vsub.f32 %v3630_v58, %v1429_v48 }
 0x400   :  { %v1492_v35 = vsel %vm1400_vm4, %v3015_v28, 0.0  ;;  %v3017_v33 = vpop.eup %3016  ;;  %v3708_v15 = vpop.xlane.xlu1 %1417 }
 0x401   :  { %1493 = vadd.xlane.f32.xlu1 %v1492_v35  ;;  %v1489_v46 = vsel %vm1400_vm4, %v3017_v33, 0.0  ;;  %v1430_v17 = vmax.f32 %v3708_v15, -1e+30  ;;  %v1473_v38 = vmul.f32 1.442695, %v1461_v9 }
 0x403   :  { %v1462_v12 = vsub.f32 %v3634_v54, %v1430_v17 }
 0x404   :  { %v3712_v44 = vpop.xlane.xlu1 %1420 }
 0x405   :  { %v1431_v6 = vmax.f32 %v3712_v44, -1e+30 }
 0x407   :  { %v1463_v29 = vsub.f32 %v3638_v11, %v1431_v6 }
 0x408   :  { %3005 = vset.pattern.permute.xlu0 %v3191_v0  ;;  %v1427_v0 = vmax.f32 %v3700_v23, -1e+30  ;;  %v3718_v4 = vpop.xlane.xlu1 %1423 }
 0x409   :  { %v1432_v58 = vmax.f32 %v3718_v4, -1e+30 }
 0x40a   :  { %v1459_v60 = vsub.f32 %v3622_v42, %v1427_v0 }
 0x40b   :  { %v1464_v26 = vsub.f32 %v3642_v13, %v1432_v58 }
 0x40c   :  { %1490 = vadd.xlane.f32.xlu0 %v1489_v46  ;;  %v1469_v49 = vmul.f32 1.442695, %v1459_v60 }
 0x40d   :  { %v1479_v9 = vmul.f32 1.442695, %v1464_v26 }
 0x40e   :  { %3018 = vpow2.f32 %v1469_v49 }
 0x418   :  { %v3019_v35 = vpop.eup %3018 }
 0x423   :  { %v3729_v47 = vpop.xlane.xlu1 %2513 }
 0x425   :  { %v3706_v39 = vpop.xlane.xlu0 %2516 }
 0x426   :  { %v2537_v61 = vmax.f32 %v3706_v39, -1e+30  ;;  %v1438_v39 = vsub.f32 -1e+30, %v1430_v17 }
 0x428   :  { %v2569_v41 = vsub.f32 %v3650_v63, %v2537_v61 }
 0x42a   :  { %v2578_v45 = vmul.f32 1.442695, %v2569_v41  ;;  %v1495_v41 = vsel %vm1400_vm4, %v3019_v35, 0.0 }
 0x42b   :  { %v3710_v37 = vpop.xlane.xlu0 %2519 }
 0x42c   :  { %3020 = vpow2.f32 %v2578_v45  ;;  %v2538_v54 = vmax.f32 %v3710_v37, -1e+30 }
 0x42d   :  { %3022 = vpow2.f32 %v1471_v14  ;;  %v1477_v14 = vmul.f32 1.442695, %v1463_v29 }
 0x42e   :  { %3024 = vpow2.f32 %v1473_v38 }
 0x42f   :  { %v3714_v51 = vpop.xlane.xlu0 %2522 }
 0x430   :  { %v2539_v13 = vmax.f32 %v3714_v51, -1e+30 }
 0x432   :  { %v2547_v36 = vsub.f32 -1e+30, %v2539_v13 }
 0x433   :  { %v3720_v30 = vpop.xlane.xlu0 %2525 }
 0x437   :  { %v3737_v3 = vpop.xlane.xlu0 %2528 }
 0x438   :  { %v2541_v46 = vmax.f32 %v3737_v3, -1e+30 }
 0x43a   :  { %v2573_v11 = vsub.f32 %v3666_v34, %v2541_v46 }
 0x43b   :  { %v3745_v32 = vpop.xlane.xlu0 %2531 }
 0x43f   :  { %v3762_v24 = vpop.xlane.xlu0 %2534 }
 0x440   :  { %v2543_v60 = vmax.f32 %v3762_v24, -1e+30 }
 0x449   :  { %v3739_v42 = vpop.trf.xlu1 }
 0x44a   :  { %v1529_v63 = vrot.slane %v3739_v42, %v3735_v62 }
 0x44c   :  { %v1537_v5 = vcombine.high %v1529_v63, %v1529_v63  ;;  %v1545_v53 = vrot.slane %v1529_v63, %v3735_v62  ;;  %v2570_v63 = vsub.f32 %v3654_v31, %v2538_v54  ;;  %v2571_v31 = vsub.f32 %v3658_v16, %v2539_v13 }
 0x44e   :  { %v3752_v57 = vrot.slane %v1537_v5, %v3735_v62  ;;  %v1574_v1 = vrot.slane %v1545_v53, %v3260_v10  ;;  %v1567_v43 = vcombine.high %v1545_v53, %v1545_v53  ;;  %v2536_v5 = vmax.f32 %v3729_v47, -1e+30 }
 0x44f   :  { %v2575_v53 = vsub.f32 %v3674_v52, %v2543_v60  ;;  %v1439_v47 = vsub.f32 -1e+30, %v1431_v6 }
 0x450   :  { %v1578_v2 = vrot.slane %v3752_v57, %v3260_v10  ;;  %v1611_v8 = vmul.f32 %v3017_v33, %v1574_v1  ;;  %v3021_v33 = vpop.eup %3020  ;;  %v1582_v49 = vrot.slane %v1567_v43, %v3260_v10  ;;  %v2568_v38 = vsub.f32 %v3646_v27, %v2536_v5 }
 0x451   :  { %v3777_v55 = vpop.eup %3022  ;;  %v2603_v45 = vsel %vm1400_vm4, %v3021_v33, 0.0 }
 0x452   :  { %v1612_v21 = vmul.f32 %v3015_v28, %v1578_v2  ;;  %v1619_v19 = vsel %vm1400_vm4, %v1611_v8, 0.0  ;;  %v1475_v28 = vmul.f32 1.442695, %v1462_v12  ;;  %v1498_v34 = vsel %vm1400_vm4, %v3777_v55, 0.0  ;;  %v3800_v43 = vpop.eup %3024 }
 0x453   :  { %1620 = vadd.xlane.f32.xlu1 %v1619_v19  ;;  %v1613_v1 = vmul.f32 %v3019_v35, %v1582_v49  ;;  %v2586_v2 = vmul.f32 1.442695, %v2573_v11  ;;  %v2580_v8 = vmul.f32 1.442695, %v2570_v63  ;;  %v2590_v12 = vmul.f32 1.442695, %v2575_v53 }
 0x454   :  { %v1622_v20 = vsel %vm1400_vm4, %v1612_v21, 0.0  ;;  %3026 = vpow2.f32 %v1475_v28  ;;  %v2576_v29 = vmul.f32 1.442695, %v2568_v38  ;;  %v1501_v28 = vsel %vm1400_vm4, %v3800_v43, 0.0 }
 0x455   :  { %1623 = vadd.xlane.f32.xlu0 %v1622_v20  ;;  %3028 = vpow2.f32 %v1477_v14  ;;  %v1625_v52 = vsel %vm1400_vm4, %v1613_v1, 0.0  ;;  %v2582_v20 = vmul.f32 1.442695, %v2571_v31  ;;  %v2540_v11 = vmax.f32 %v3720_v30, -1e+30 }
 0x456   :  { %3030 = vpow2.f32 %v1479_v9  ;;  %v1522_v53 = vcombine.high %v3739_v42, %v3739_v42 }
 0x457   :  { %1496 = vadd.xlane.f32.xlu1 %v1495_v41  ;;  %3032 = vpow2.f32 %v2586_v2 }
 0x458   :  { %3034 = vpow2.f32 %v2580_v8  ;;  %v2572_v8 = vsub.f32 %v3662_v50, %v2540_v11  ;;  %v1569_v50 = vcombine.high %v3752_v57, %v3752_v57 }
 0x459   :  { %2604 = vadd.xlane.f32.xlu0 %v2603_v45  ;;  %3036 = vpow2.f32 %v2590_v12 }
 0x45a   :  { %3038 = vpow2.f32 %v2582_v20 }
 0x45b   :  { %1499 = vadd.xlane.f32.xlu1 %v1498_v34  ;;  %3040 = vpow2.f32 %v2576_v29 }
 0x45e   :  { %v3808_v26 = vpop.eup %3026 }
 0x45f   :  { %v1690_v21 = vpop.trf.xlu0  ;;  %1626 = vadd.xlane.f32.xlu1 %v1625_v52  ;;  %v3818_v63 = vpop.eup %3028  ;;  %v1504_v9 = vsel %vm1400_vm4, %v3808_v26, 0.0 }
 0x460   :  { %v2633_v19 = vcombine.high %v1690_v21, %v1690_v21  ;;  %v2640_v35 = vrot.slane %v1690_v21, %v3735_v62  ;;  %v3825_v2 = vpop.eup %3030  ;;  %v1507_v52 = vsel %vm1400_vm4, %v3818_v63, 0.0 }
 0x461   :  { %v3831_v12 = vpop.eup %3032 }
 0x462   :  { %v3804_v16 = vrot.slane %v2633_v19, %v3735_v62  ;;  %v2648_v27 = vcombine.high %v2640_v35, %v2640_v35  ;;  %v3815_v45 = vrot.slane %v2640_v35, %v3735_v62  ;;  %v1536_v19 = vrot.slane %v1522_v53, %v3735_v62 }
 0x463   :  { %1502 = vadd.xlane.f32.xlu1 %v1501_v28 }
 0x464   :  { %v2649_v41 = vcombine.high %v3804_v16, %v3804_v16  ;;  %v2670_v49 = vrot.slane %v2648_v27, %v3735_v62  ;;  %v2678_v42 = vcombine.high %v3815_v45, %v3815_v45  ;;  %v2584_v27 = vmul.f32 1.442695, %v2572_v8 }
 0x465   :  { %v1552_v57 = vrot.slane %v1536_v19, %v3735_v62  ;;  %v2542_v8 = vmax.f32 %v3745_v32, -1e+30 }
 0x466   :  { %v2689_v14 = vrot.slane %v2670_v49, %v3260_v10  ;;  %v2677_v34 = vrot.slane %v2649_v41, %v3735_v62  ;;  %v2680_v53 = vcombine.high %v2670_v49, %v2670_v49  ;;  %3042 = vpow2.f32 %v2584_v27 }
 0x467   :  { %1505 = vadd.xlane.f32.xlu1 %v1504_v9  ;;  %v1538_v49 = vcombine.high %v1536_v19, %v1536_v19 }
 0x468   :  { %v2723_v1 = vmul.f32 %v3021_v33, %v2689_v14  ;;  %v2705_v31 = vrot.slane %v2677_v34, %v3260_v10  ;;  %v2681_v38 = vcombine.high %v2677_v34, %v2677_v34  ;;  %v3035_v33 = vpop.eup %3034  ;;  %v2693_v14 = vrot.slane %v2678_v42, %v3260_v10 }
 0x469   :  { %v3845_v29 = vpop.eup %3036  ;;  %v2606_v41 = vsel %vm1400_vm4, %v3035_v33, 0.0  ;;  %v1510_v34 = vsel %vm1400_vm4, %v3825_v2, 0.0  ;;  %v2697_v42 = vrot.slane %v2680_v53, %v3260_v10 }
 0x46a   :  { %v2733_v21 = vsel %vm1400_vm4, %v2723_v1, 0.0  ;;  %v3842_v35 = vmul.f32 %v3831_v12, %v2705_v31  ;;  %v2713_v20 = vrot.slane %v2681_v38, %v3260_v10  ;;  %v3039_v9 = vpop.eup %3038  ;;  %v1586_v1 = vrot.slane %v1569_v50, %v3260_v10 }
 0x46b   :  { %2734 = vadd.xlane.f32.xlu0 %v2733_v21  ;;  %1508 = vadd.xlane.f32.xlu1 %v1507_v52  ;;  %v3041_v31 = vpop.eup %3040  ;;  %v2609_v38 = vsel %vm1400_vm4, %v3039_v9, 0.0  ;;  %v2724_v52 = vmul.f32 %v3035_v33, %v2693_v14  ;;  %v2574_v50 = vsub.f32 %v3670_v56, %v2542_v8  ;;  %v2685_v14 = vrot.slane %v3815_v45, %v3260_v10 }
 0x46c   :  { %v3848_v28 = vmul.f32 %v3845_v29, %v2713_v20  ;;  %v2600_v21 = vsel %vm1400_vm4, %v3041_v31, 0.0  ;;  %v1614_v20 = vmul.f32 %v3777_v55, %v1586_v1  ;;  %v1566_v55 = vrot.slane %v1538_v49, %v3735_v62 }
 0x46d   :  { %v2736_v27 = vsel %vm1400_vm4, %v2724_v52, 0.0  ;;  %v2588_v53 = vmul.f32 1.442695, %v2574_v50  ;;  %v2663_v1 = vrot.slane %v3804_v16, %v3735_v62  ;;  %v2722_v52 = vmul.f32 %v3041_v31, %v2685_v14 }
 0x46e   :  { %v1628_v33 = vsel %vm1400_vm4, %v1614_v20, 0.0  ;;  %v1570_v20 = vcombine.high %v1566_v55, %v1566_v55  ;;  %v2615_v31 = vsel %vm1400_vm4, %v3831_v12, 0.0 }
 0x46f   :  { %2607 = vadd.xlane.f32.xlu0 %v2606_v41  ;;  %1511 = vadd.xlane.f32.xlu1 %v1510_v34  ;;  %v1590_v41 = vrot.slane %v1552_v57, %v3260_v10  ;;  %v2725_v34 = vmul.f32 %v3039_v9, %v2697_v42  ;;  %v1594_v42 = vrot.slane %v1566_v55, %v3260_v10  ;;  %3044 = vpow2.f32 %v2588_v53 }
 0x470   :  { %v2701_v49 = vrot.slane %v2663_v1, %v3260_v10  ;;  %v2679_v14 = vcombine.high %v2663_v1, %v2663_v1  ;;  %v2751_v1 = vsel %vm1400_vm4, %v3848_v28, 0.0 }
 0x471   :  { %v1615_v19 = vmul.f32 %v3800_v43, %v1590_v41  ;;  %v2739_v56 = vsel %vm1400_vm4, %v2725_v34, 0.0  ;;  %v1568_v43 = vcombine.high %v1552_v57, %v1552_v57  ;;  %v1616_v62 = vmul.f32 %v3808_v26, %v1594_v42 }
 0x472   :  { %v2709_v53 = vrot.slane %v2679_v14, %v3260_v10  ;;  %v2545_v14 = vsub.f32 -1e+30, %v2537_v61 }
 0x473   :  { %2610 = vadd.xlane.f32.xlu0 %v2609_v38  ;;  %2601 = vadd.xlane.f32.xlu1 %v2600_v21  ;;  %v3043_v38 = vpop.eup %3042  ;;  %v1631_v9 = vsel %vm1400_vm4, %v1615_v19, 0.0  ;;  %v2730_v21 = vsel %vm1400_vm4, %v2722_v52, 0.0  ;;  %v1598_v16 = vrot.slane %v1568_v43, %v3260_v10  ;;  %v1634_v57 = vsel %vm1400_vm4, %v1616_v62, 0.0 }
 0x474   :  { %v2612_v45 = vsel %vm1400_vm4, %v3043_v38, 0.0  ;;  %v2726_v41 = vmul.f32 %v3043_v38, %v2701_v49 }
 0x475   :  { %v1617_v50 = vmul.f32 %v3818_v63, %v1598_v16  ;;  %v2621_v63 = vsel %vm1400_vm4, %v3845_v29, 0.0  ;;  %v1433_v29 = vsub.f32 -1e+30, %v1425_v22  ;;  %v1436_v22 = vsub.f32 -1e+30, %v1428_v25 }
 0x476   :  { %v2742_v34 = vsel %vm1400_vm4, %v2726_v41, 0.0 }
 0x477   :  { %2737 = vadd.xlane.f32.xlu0 %v2736_v27  ;;  %1629 = vadd.xlane.f32.xlu1 %v1628_v33  ;;  %v1602_v27 = vrot.slane %v1570_v20, %v3260_v10  ;;  %v1637_v26 = vsel %vm1400_vm4, %v1617_v50, 0.0  ;;  %v1441_v52 = vmul.f32 1.442695, %v1433_v29  ;;  %v1453_v29 = vmul.f32 1.442695, %v1439_v47 }
 0x479   :  { %v3045_v33 = vpop.eup %3044  ;;  %v1618_v19 = vmul.f32 %v3825_v2, %v1602_v27 }
 0x47a   :  { %v2618_v12 = vsel %vm1400_vm4, %v3045_v33, 0.0  ;;  %v2728_v38 = vmul.f32 %v3045_v33, %v2709_v53  ;;  %v1447_v33 = vmul.f32 1.442695, %v1436_v22  ;;  %v2554_v53 = vmul.f32 1.442695, %v2545_v14 }
 0x47b   :  { %2740 = vadd.xlane.f32.xlu0 %v2739_v56  ;;  %1632 = vadd.xlane.f32.xlu1 %v1631_v9  ;;  %v1640_v55 = vsel %vm1400_vm4, %v1618_v19, 0.0  ;;  %v2745_v56 = vsel %vm1400_vm4, %v3842_v35, 0.0  ;;  %v1434_v9 = vsub.f32 -1e+30, %v1426_v40  ;;  %v1435_v35 = vsub.f32 -1e+30, %v1427_v0 }
 0x47c   :  { %v2748_v2 = vsel %vm1400_vm4, %v2728_v38, 0.0  ;;  %v2558_v38 = vmul.f32 1.442695, %v2547_v36 }
 0x47d   :  { %v1443_v10 = vmul.f32 1.442695, %v1434_v9  ;;  %v1445_v49 = vmul.f32 1.442695, %v1435_v35 }
 0x47f   :  { %2613 = vadd.xlane.f32.xlu0 %v2612_v45  ;;  %2731 = vadd.xlane.f32.xlu1 %v2730_v21  ;;  %3046 = vpow2.f32 %v1443_v10  ;;  %v2548_v10 = vsub.f32 -1e+30, %v2540_v11 }
 0x480   :  { %3048 = vpow2.f32 %v1441_v52 }
 0x481   :  { %3050 = vpow2.f32 %v1445_v49  ;;  %v2560_v4 = vmul.f32 1.442695, %v2548_v10 }
 0x483   :  { %2616 = vadd.xlane.f32.xlu0 %v2615_v31  ;;  %1635 = vadd.xlane.f32.xlu1 %v1634_v57 }
 0x487   :  { %2743 = vadd.xlane.f32.xlu0 %v2742_v34  ;;  %1638 = vadd.xlane.f32.xlu1 %v1637_v26  ;;  %v1437_v26 = vsub.f32 -1e+30, %v1429_v48 }
 0x489   :  { %v3047_v42 = vpop.eup %3046  ;;  %v1449_v25 = vmul.f32 1.442695, %v1437_v26 }
 0x48a   :  { %v3049_v43 = vpop.eup %3048  ;;  %v1482_v21 = vmul.f32 0.0, %v3047_v42 }
 0x48b   :  { %2619 = vadd.xlane.f32.xlu0 %v2618_v12  ;;  %1641 = vadd.xlane.f32.xlu1 %v1640_v55  ;;  %v1481_v62 = vmul.f32 0.0, %v3049_v43  ;;  %v3051_v18 = vpop.eup %3050  ;;  %v2546_v55 = vsub.f32 -1e+30, %v2538_v54  ;;  %v1451_v54 = vmul.f32 1.442695, %v1438_v39 }
 0x48c   :  { %v1483_v57 = vmul.f32 0.0, %v3051_v18 }
 0x48d   :  { %v2556_v61 = vmul.f32 1.442695, %v2546_v55 }
 0x48e   :  { %v1494_v45 = vpop.xlane.xlu1 %1493 }
 0x48f   :  { %2622 = vadd.xlane.f32.xlu0 %v2621_v63  ;;  %v1514_v16 = vadd.f32 %v1494_v45, %v1482_v21  ;;  %v2544_v63 = vsub.f32 -1e+30, %v2536_v5  ;;  %v1440_v5 = vsub.f32 -1e+30, %v1432_v58  ;;  %v2549_v58 = vsub.f32 -1e+30, %v2541_v46 }
 0x491   :  { %3052 = vrcp.f32 %v1514_v16  ;;  %v1455_v6 = vmul.f32 1.442695, %v1440_v5  ;;  %v2562_v18 = vmul.f32 1.442695, %v2549_v58 }
 0x493   :  { %2746 = vadd.xlane.f32.xlu0 %v2745_v56  ;;  %v2552_v56 = vmul.f32 1.442695, %v2544_v63 }
 0x497   :  { %2749 = vadd.xlane.f32.xlu0 %v2748_v2 }
 0x499   :  { %v1491_v28 = vpop.xlane.xlu0 %1490 }
 0x49a   :  { %v1513_v7 = vadd.f32 %v1491_v28, %v1481_v62 }
 0x49b   :  { %2752 = vadd.xlane.f32.xlu0 %v2751_v1  ;;  %v3053_v0 = vpop.eup %3052 }
 0x49c   :  { %3054 = vrcp.f32 %v1513_v7 }
 0x4a6   :  { %v3055_v41 = vpop.eup %3054 }
 0x4e0   :  { %v1621_v40 = vpop.xlane.xlu1 %1620 }
 0x4e1   :  { %v1643_v20 = vadd.f32 %v1621_v40, %v1481_v62 }
 0x4e2   :  { %v1624_v23 = vpop.xlane.xlu0 %1623 }
 0x4e3   :  { %v1644_v31 = vadd.f32 %v1624_v23, %v1482_v21  ;;  %v1659_v50 = vmul.f32 %v3055_v41, %v1643_v20  ;;  %v2550_v41 = vsub.f32 -1e+30, %v2542_v8 }
 0x4e4   :  { %v1497_v34 = vpop.xlane.xlu1 %1496 }
 0x4e5   :  { %v1660_v27 = vmul.f32 %v3053_v0, %v1644_v31  ;;  %v1515_v19 = vadd.f32 %v1497_v34, %v1483_v57  ;;  %v2564_v14 = vmul.f32 1.442695, %v2550_v41 }
 0x4e6   :  { %v2605_v15 = vpop.xlane.xlu0 %2604 }
 0x4e7   :  { %v1667_v12 = vadd.f32 %v1660_v27, %v1659_v50  ;;  %3056 = vrcp.f32 %v1515_v19 }
 0x4e8   :  { %v1500_v59 = vpop.xlane.xlu1 %1499  ;;  %3058 = vpow2.f32 %v1447_v33 }
 0x4e9   :  { %3060 = vpow2.f32 %v1449_v25 }
 0x4ea   :  { %3062 = vpow2.f32 %v2554_v53 }
 0x4eb   :  { %3064 = vpow2.f32 %v2556_v61 }
 0x4ec   :  { %v1627_v48 = vpop.xlane.xlu1 %1626  ;;  %3066 = vpow2.f32 %v2552_v56 }
 0x4ed   :  { %v1645_v2 = vadd.f32 %v1627_v48, %v1483_v57  ;;  %3068 = vpow2.f32 %v2558_v38 }
 0x4ee   :  { %3070 = vpow2.f32 %v1451_v54 }
 0x4ef   :  { %3072 = vpow2.f32 %v1453_v29 }
 0x4f0   :  { %v1503_v1 = vpop.xlane.xlu1 %1502  ;;  %3074 = vpow2.f32 %v1455_v6 }
 0x4f1   :  { %v3057_v37 = vpop.eup %3056 }
 0x4f2   :  { %v1661_v51 = vmul.f32 %v3057_v37, %v1645_v2  ;;  %v3059_v13 = vpop.eup %3058 }
 0x4f3   :  { %v1484_v52 = vmul.f32 0.0, %v3059_v13  ;;  %v3061_v44 = vpop.eup %3060 }
 0x4f4   :  { %v3923_v17 = vadd.f32 %v1667_v12, %v1661_v51  ;;  %v1506_v9 = vpop.xlane.xlu1 %1505  ;;  %v3063_v45 = vpop.eup %3062  ;;  %v1485_v49 = vmul.f32 0.0, %v3061_v44 }
 0x4f5   :  { %v1516_v42 = vadd.f32 %v1500_v59, %v1484_v52  ;;  %v3065_v21 = vpop.eup %3064  ;;  %v2593_v16 = vmul.f32 0.0, %v3063_v45  ;;  %v2551_v59 = vsub.f32 -1e+30, %v2543_v60 }
 0x4f6   :  { %v3067_v62 = vpop.eup %3066  ;;  %v1517_v30 = vadd.f32 %v1503_v1, %v1485_v49  ;;  %v2594_v22 = vmul.f32 0.0, %v3065_v21 }
 0x4f7   :  { %3076 = vrcp.f32 %v1516_v42  ;;  %v3069_v7 = vpop.eup %3068  ;;  %v2625_v40 = vadd.f32 %v2605_v15, %v2593_v16  ;;  %v2592_v23 = vmul.f32 0.0, %v3067_v62  ;;  %v2566_v39 = vmul.f32 1.442695, %v2551_v59 }
 0x4f8   :  { %v2735_v35 = vpop.xlane.xlu0 %2734  ;;  %v1509_v43 = vpop.xlane.xlu1 %1508  ;;  %3078 = vpow2.f32 %v2560_v4  ;;  %v2595_v31 = vmul.f32 0.0, %v3069_v7 }
 0x4f9   :  { %v3071_v20 = vpop.eup %3070  ;;  %3080 = vrcp.f32 %v1517_v30  ;;  %v2755_v60 = vadd.f32 %v2735_v35, %v2593_v16 }
 0x4fa   :  { %3082 = vpow2.f32 %v2562_v18  ;;  %v1486_v50 = vmul.f32 0.0, %v3071_v20  ;;  %v3073_v34 = vpop.eup %3072 }
 0x4fb   :  { %3084 = vrcp.f32 %v2625_v40  ;;  %v3075_v12 = vpop.eup %3074  ;;  %v1487_v63 = vmul.f32 0.0, %v3073_v34 }
 0x4fc   :  { %v2608_v28 = vpop.xlane.xlu0 %2607  ;;  %v1512_v11 = vpop.xlane.xlu1 %1511  ;;  %v1518_v26 = vadd.f32 %v1506_v9, %v1486_v50  ;;  %v1488_v2 = vmul.f32 0.0, %v3075_v12 }
 0x4fd   :  { %v2626_v3 = vadd.f32 %v2608_v28, %v2594_v22  ;;  %v1519_v36 = vadd.f32 %v1509_v43, %v1487_v63 }
 0x4fe   :  { %v1520_v51 = vadd.f32 %v1512_v11, %v1488_v2 }
 0x500   :  { %v2611_v0 = vpop.xlane.xlu0 %2610  ;;  %v2602_v46 = vpop.xlane.xlu1 %2601 }
 0x501   :  { %v2624_v57 = vadd.f32 %v2602_v46, %v2592_v23  ;;  %v2627_v27 = vadd.f32 %v2611_v0, %v2595_v31  ;;  %v3077_v55 = vpop.eup %3076 }
 0x502   :  { %v3079_v32 = vpop.eup %3078 }
 0x503   :  { %3086 = vrcp.f32 %v2624_v57  ;;  %v3081_v38 = vpop.eup %3080  ;;  %v2596_v1 = vmul.f32 0.0, %v3079_v32 }
 0x504   :  { %v2738_v33 = vpop.xlane.xlu0 %2737  ;;  %3088 = vrcp.f32 %v2626_v3  ;;  %v1630_v19 = vpop.xlane.xlu1 %1629 }
 0x505   :  { %v1646_v25 = vadd.f32 %v1630_v19, %v1484_v52  ;;  %3090 = vrcp.f32 %v2627_v27  ;;  %v3083_v24 = vpop.eup %3082  ;;  %v2756_v52 = vadd.f32 %v2738_v33, %v2594_v22 }
 0x506   :  { %3092 = vrcp.f32 %v1518_v26  ;;  %v3085_v47 = vpop.eup %3084  ;;  %v2597_v43 = vmul.f32 0.0, %v3083_v24 }
 0x507   :  { %v1662_v8 = vmul.f32 %v3077_v55, %v1646_v25  ;;  %3094 = vpow2.f32 %v2564_v14 }
 0x508   :  { %v2741_v53 = vpop.xlane.xlu0 %2740  ;;  %v1633_v48 = vpop.xlane.xlu1 %1632  ;;  %3096 = vrcp.f32 %v1519_v36 }
 0x509   :  { %v1669_v61 = vadd.f32 %v3923_v17, %v1662_v8  ;;  %v1647_v56 = vadd.f32 %v1633_v48, %v1485_v49  ;;  %3098 = vpow2.f32 %v2566_v39  ;;  %v2771_v17 = vmul.f32 %v3085_v47, %v2755_v60 }
 0x50a   :  { %v2757_v4 = vadd.f32 %v2741_v53, %v2595_v31 }
 0x50b   :  { %v1663_v37 = vmul.f32 %v3081_v38, %v1647_v56 }
 0x50c   :  { %v2614_v54 = vpop.xlane.xlu0 %2613  ;;  %v2732_v13 = vpop.xlane.xlu1 %2731 }
 0x50d   :  { %v2628_v5 = vadd.f32 %v2614_v54, %v2596_v1  ;;  %v3087_v15 = vpop.eup %3086  ;;  %v1670_v9 = vadd.f32 %v1669_v61, %v1663_v37  ;;  %v2754_v29 = vadd.f32 %v2732_v13, %v2592_v23 }
 0x50e   :  { %v3089_v10 = vpop.eup %3088 }
 0x50f   :  { %3100 = vrcp.f32 %v2628_v5  ;;  %v2770_v44 = vmul.f32 %v3087_v15, %v2754_v29  ;;  %v3091_v42 = vpop.eup %3090  ;;  %v2772_v45 = vmul.f32 %v3089_v10, %v2756_v52  ;;  %v3112_v15 = vld [vmem:[#allocation2 + $0x8] sm:$0xff] }
 0x510   :  { %v2617_v6 = vpop.xlane.xlu0 %2616  ;;  %3102 = vrcp.f32 %v1520_v51  ;;  %v1636_v35 = vpop.xlane.xlu1 %1635  ;;  %v2773_v62 = vmul.f32 %v3091_v42, %v2757_v4  ;;  %v3111_v51 = vld [vmem:[#allocation2] sm:$0xff] }
 0x511   :  { %v2778_v58 = vadd.f32 %v2771_v17, %v2770_v44  ;;  %v1648_v49 = vadd.f32 %v1636_v35, %v1486_v50  ;;  %v3093_v21 = vpop.eup %3092  ;;  %v2629_v11 = vadd.f32 %v2617_v6, %v2597_v43 }
 0x512   :  { %v3095_v28 = vpop.eup %3094 }
 0x513   :  { %v2779_v16 = vadd.f32 %v2778_v58, %v2772_v45  ;;  %v1664_v30 = vmul.f32 %v3093_v21, %v1648_v49  ;;  %v3097_v23 = vpop.eup %3096  ;;  %v2598_v0 = vmul.f32 0.0, %v3095_v28  ;;  %3104 = vrcp.f32 %v2629_v11 }
 0x514   :  { %v2744_v7 = vpop.xlane.xlu0 %2743  ;;  %v1639_v18 = vpop.xlane.xlu1 %1638 }
 0x515   :  { %v1671_v40 = vadd.f32 %v1670_v9, %v1664_v30  ;;  %v1649_v22 = vadd.f32 %v1639_v18, %v1487_v63  ;;  %v2780_v20 = vadd.f32 %v2779_v16, %v2773_v62  ;;  %v3099_v3 = vpop.eup %3098  ;;  %v2758_v41 = vadd.f32 %v2744_v7, %v2596_v1 }
 0x516   :  { %v2599_v12 = vmul.f32 0.0, %v3099_v3 }
 0x517   :  { %v1665_v46 = vmul.f32 %v3097_v23, %v1649_v22 }
 0x518   :  { %v2620_v31 = vpop.xlane.xlu0 %2619  ;;  %v1642_v50 = vpop.xlane.xlu1 %1641 }
 0x519   :  { %v3101_v57 = vpop.eup %3100  ;;  %v2630_v27 = vadd.f32 %v2620_v31, %v2598_v0  ;;  %v1672_v34 = vadd.f32 %v1671_v40, %v1665_v46  ;;  %v1650_v26 = vadd.f32 %v1642_v50, %v1488_v2 }
 0x51a   :  { %v2774_v33 = vmul.f32 %v3101_v57, %v2758_v41  ;;  %v3103_v19 = vpop.eup %3102 }
 0x51b   :  { %3106 = vrcp.f32 %v2630_v27  ;;  %v1666_v59 = vmul.f32 %v3103_v19, %v1650_v26 }
 0x51c   :  { %v2781_v14 = vadd.f32 %v2780_v20, %v2774_v33  ;;  %v2623_v25 = vpop.xlane.xlu0 %2622 }
 0x51d   :  { %v2631_v55 = vadd.f32 %v2623_v25, %v2599_v12  ;;  %v1673_v63 = vadd.f32 %v1672_v34, %v1666_v59  ;;  %v3105_v53 = vpop.eup %3104 }
 0x51f   :  { %3108 = vrcp.f32 %v2631_v55  ;;  %2787 = vperm.xlu1 %3004, %v1673_v63  }
 0x520   :  { %v2747_v32 = vpop.xlane.xlu0 %2746 }
 0x521   :  { %v2759_v8 = vadd.f32 %v2747_v32, %v2597_v43 }
 0x523   :  { %v2775_v36 = vmul.f32 %v3105_v53, %v2759_v8 }
 0x524   :  { %v2750_v48 = vpop.xlane.xlu0 %2749 }
 0x525   :  { %v3107_v39 = vpop.eup %3106  ;;  %v2782_v61 = vadd.f32 %v2781_v14, %v2775_v36  ;;  %v2760_v56 = vadd.f32 %v2750_v48, %v2598_v0 }
 0x527   :  { %v2776_v38 = vmul.f32 %v3107_v39, %v2760_v56 }
 0x528   :  { %v2753_v2 = vpop.xlane.xlu0 %2752 }
 0x529   :  { %v3109_v1 = vpop.eup %3108  ;;  %v2783_v24 = vadd.f32 %v2782_v61, %v2776_v38  ;;  %v2761_v60 = vadd.f32 %v2753_v2, %v2599_v12 }
 0x52b   :  { %v2777_v37 = vmul.f32 %v3109_v1, %v2761_v60 }
 0x52d   :  { %v2784_v54 = vadd.f32 %v2783_v24, %v2777_v37 }
 0x52f   :  { %2792 = vperm.xlu0 %3005, %v2784_v54  }
 0x59e   :  { %v2788_v47 = vpop.permute.xlu1 %2787 }
 0x59f   :  { %v2795_v13 = vmul.f32 %v3111_v51, %v2788_v47 }
 0x5a1   :  { %2797 = vst.msk [vmem:[#allocation7] sm:$0xff] %vm104_vm0, %v2795_v13 }
 0x5ae   :  { %v2793_v5 = vpop.permute.xlu0 %2792 }
 0x5af   :  { %v2796_v9 = vmul.f32 %v3112_v15, %v2793_v5 }
 0x5b1   :  { %2798 = vst.msk [vmem:[#allocation7 + $0x8] sm:$0xff] %vm104_vm0, %v2796_v9 }
 0x5b2   :  { %3168 = shalt.err (!%p3165_p6)
}
 0x5b3   :  { %s3169_s28 = scalar_lea.hbm %s3954_s3, 256 }
 0x5b4   :  { %p3170_p7 = scmp.ne.s32.totalorder %s3954_s3, %s3169_s28  ;;  %p3173_p8 = scmp.lt.u32.totalorder %s3169_s28, %s3954_s3 }
 0x5b6   :  { %p3175_p9 = pnand %p3173_p8, %p3170_p7 }
 0x5b8   :  { %3178 = shalt.err (!%p3175_p9)
}
 0x5b9   :  { %2810 = dma.vmem_to_hbm [thread:$0]  %s2805_s24, 256, %s3954_s3, [#allocation4], %s3186_s22, %s3186_s22, %s3187_s23  }
 0x5ba   :  { %3183 = dma.done.wait [#allocation4], 256  }
 0x5bb   :  { %3184 = vsyncadd [#allocation4], 4294967040 }
 0x5bc   :  { %2814 = vsyncpa [#allocation3], 1 }
 0x5bd   :  { %2815 = vsyncpa [#allocation6], 1 }
 0x5be   :  { %2816 = vsyncpa [#allocation4], 1 }

</bundles_post_ra>
